<compile_context>
chip_gen: v6e
topology: v6e:2x2x1
jax: 0.10.0
libtpu: 0.0.40
codegen_flags: <defaults>
</compile_context>

<pallas_src>
import jax
import jax.numpy as jnp
from jax import lax
from jax.experimental import pallas as pl
from jax.experimental.pallas import tpu as pltpu


def lstm_last_kernel(x_ref, wih_ref, whh_ref, b_ref, out_ref, gx_ref):
    """x_ref: (T*B, D) bf16, wih_ref: (D, 4H) bf16, whh_ref: (H, 4H) bf16,
    b_ref: (1, 4H) f32, out_ref: (B, H) f32, gx_ref: (T*B, 4H) f32 scratch.
    Gate column order is [i, f, o, g]; the i/f/o columns of the weights and
    bias are pre-scaled by 0.5 in the wrapper (sigmoid-via-tanh identity)."""
    B, H = out_ref.shape
    TB = x_ref.shape[0]
    T = TB // B
    H4 = 4 * H

    # Input projection of every time step in one batched MXU matmul, bias
    # folded in once (no per-step x@W_ih on the serial critical path).
    gx_ref[...] = (
        jnp.dot(x_ref[...], wih_ref[...], preferred_element_type=jnp.float32)
        + b_ref[...]
    )

    whh = whh_ref[...]  # (H, 4H) bf16, loop-invariant RHS hoisted out of the loop
    # TODO(synk): pin W_hh in the MXU across the unrolled loop with explicit
    # pltpu.matmul_push_rhs / matmul_acc_lhs (and MRB accumulate of gx on v7x);
    # kept as jnp.dot here for portability/robustness.

    # Lane-constant affine hoisted out of the loop: turns tanh(z/2) into
    # sigmoid(z) on lanes [0, 3H) (i|f|o) and is identity on lanes [3H, 4H) (g).
    lane = lax.broadcasted_iota(jnp.int32, (1, H4), 1)
    is_sig = lane < 3 * H
    scale = jnp.where(is_sig, jnp.float32(0.5), jnp.float32(1.0))
    shift = jnp.where(is_sig, jnp.float32(0.5), jnp.float32(0.0))

    def step(t, carry):
        h, c = carry                                           # f32 (B, H)
        gates = gx_ref[pl.ds(t * B, B), :] + jnp.dot(
            h.astype(whh.dtype), whh, preferred_element_type=jnp.float32
        )                                                      # (B, 4H) f32
        # Single EUP dispatch over the full (B, 4H) slab; whole-vreg fma
        # recovers the sigmoids:  sigmoid(z) = 0.5 * tanh(z/2) + 0.5.
        act = jnp.tanh(gates) * scale + shift                  # [i_s|f_s|o_s|g_t]
        i_g = act[:, :H]
        f_g = act[:, H:2 * H]
        o_g = act[:, 2 * H:3 * H]
        g_g = act[:, 3 * H:]
        c = f_g * c + i_g * g_g
        h = o_g * jnp.tanh(c)                                  # 2nd (last) EUP dispatch
        return h, c

    h0 = jnp.zeros((B, H), jnp.float32)
    c0 = jnp.zeros((B, H), jnp.float32)
    hT, _ = lax.fori_loop(0, T, step, (h0, c0), unroll=True)

    out_ref[...] = hT.astype(out_ref.dtype)


def lstm_last_hidden(x2d, w_ih_t, w_hh_t, bias, batch, hidden_size):
    """x2d: (T*B, D) bf16 (time-major, flattened over time*batch).
    Returns h_T: (batch, hidden_size) f32."""
    TB, D = x2d.shape
    H4 = 4 * hidden_size
    return pl.pallas_call(
        lstm_last_kernel,
        out_shape=jax.ShapeDtypeStruct((batch, hidden_size), jnp.float32),
        grid_spec=pltpu.PrefetchScalarGridSpec(
            num_scalar_prefetch=0,
            grid=(1,),  # single grid point: whole problem resident in VMEM
            in_specs=[
                pl.BlockSpec((TB, D), lambda i: (0, 0)),            # x, all steps
                pl.BlockSpec((D, H4), lambda i: (0, 0)),            # W_ih^T (pre-scaled)
                pl.BlockSpec((hidden_size, H4), lambda i: (0, 0)),  # W_hh^T (pre-scaled)
                pl.BlockSpec((1, H4), lambda i: (0, 0)),            # bias (f32, pre-scaled)
            ],
            out_specs=pl.BlockSpec((batch, hidden_size), lambda i: (0, 0)),
            scratch_shapes=[
                pltpu.VMEM((TB, H4), jnp.float32),  # precomputed input gates
            ],
        ),
        compiler_params=pltpu.CompilerParams(
            dimension_semantics=("arbitrary",),
            vmem_limit_bytes=32 * 1024 * 1024,  # explicit guard; usage is ~100 KiB
        ),
    )(x2d, w_ih_t, w_hh_t, bias)


def _reorder_and_prescale_gates(w):
    """PyTorch LSTM gate blocks are stacked [i, f, g, o] along axis 0.
    Reorder to [i, f, o, g] (sigmoid gates contiguous) and pre-scale the
    sigmoid blocks by 0.5 so the kernel can use a single full-slab tanh plus
    the identity sigmoid(z) = 0.5*tanh(z/2) + 0.5.  (0.5 scale is exact in
    bf16 -> no extra quantization error.)"""
    i, f, g, o = jnp.split(w, 4, axis=0)
    return jnp.concatenate([0.5 * i, 0.5 * f, 0.5 * o, g], axis=0)


def rnn_c_forward(x, params, hidden_size):
    """Mirrors RNN_c.forward.  x: (B, C, H, W) f32 -> (B, hidden_size) f32."""
    B, C, H, W = x.shape
    D = C * H
    # torch.cat over channels -> (B, C*H, W); permute(0,2,1) -> (B, W, C*H).
    # Kernel wants time-major flattened (T*B, D) so the input projection for
    # all steps is one matmul.  (C == 1 squeeze case is the same reshape.)
    x_seq = jnp.transpose(x.reshape(B, D, W), (2, 0, 1))       # (T=W, B, D)
    x2d = x_seq.reshape(W * B, D).astype(jnp.bfloat16)

    w_ih, w_hh, b_ih, b_hh = params
    w_ih_t = jnp.transpose(_reorder_and_prescale_gates(w_ih)).astype(jnp.bfloat16)  # (D, 4H)
    w_hh_t = jnp.transpose(_reorder_and_prescale_gates(w_hh)).astype(jnp.bfloat16)  # (H, 4H)
    bias = _reorder_and_prescale_gates(b_ih + b_hh).reshape(1, 4 * hidden_size)     # f32

    return lstm_last_hidden(x2d, w_ih_t, w_hh_t, bias, B, hidden_size)


def lstm_reference(x_seq, w_ih, w_hh, b_ih, b_hh, hidden_size):
    """Pure-JAX f32 reference (lax.scan) of the same LSTM; returns h_T."""
    T, B, D = x_seq.shape
    h0 = jnp.zeros((B, hidden_size), jnp.float32)
    c0 = jnp.zeros((B, hidden_size), jnp.float32)

    def step(carry, x_t):
        h, c = carry
        gates = x_t @ w_ih.T + b_ih + h @ w_hh.T + b_hh
        i, f, g, o = jnp.split(gates, 4, axis=-1)
        c = jax.nn.sigmoid(f) * c + jax.nn.sigmoid(i) * jnp.tanh(g)
        h = jax.nn.sigmoid(o) * jnp.tanh(c)
        return (h, c), None

    (hT, _), _ = lax.scan(step, (h0, c0), x_seq)
    return hT


if __name__ == "__main__":
    # input_size = C*H = 64, seq_len = W = 16
    B, C, H, W = 2, 4, 16, 16
    hidden_size = 32
    input_size = C * H

    key = jax.random.PRNGKey(0)
    kx, k1, k2, k3, k4 = jax.random.split(key, 5)

    x = jax.random.normal(kx, (B, C, H, W), dtype=jnp.float32)

    # PyTorch-style uniform(-1/sqrt(H), 1/sqrt(H)) LSTM parameters.
    bound = 1.0 / jnp.sqrt(jnp.float32(hidden_size))
    w_ih = jax.random.uniform(k1, (4 * hidden_size, input_size), jnp.float32, -bound, bound)
    w_hh = jax.random.uniform(k2, (4 * hidden_size, hidden_size), jnp.float32, -bound, bound)
    b_ih = jax.random.uniform(k3, (4 * hidden_size,), jnp.float32, -bound, bound)
    b_hh = jax.random.uniform(k4, (4 * hidden_size,), jnp.float32, -bound, bound)
    params = (w_ih, w_hh, b_ih, b_hh)

    out = jax.block_until_ready(rnn_c_forward(x, params, hidden_size))
    assert out.shape == (B, hidden_size)

    # Correctness check against the f32 lax.scan reference (bf16 MXU operands,
    # f32 accumulation, sigmoid-via-tanh identity -> check max-abs error).
    x_seq = jnp.transpose(x.reshape(B, C * H, W), (2, 0, 1))
    ref = jax.block_until_ready(
        lstm_reference(x_seq, w_ih, w_hh, b_ih, b_hh, hidden_size))
    max_err = float(jnp.max(jnp.abs(out - ref)))
    assert max_err < 2e-2, f"max abs error {max_err}"

    print("KERNEL_OK")
</pallas_src>

<mosaic_0001>
module attributes {stable_mosaic.version = 11 : i64} {
  func.func @lstm_last_kernel(%arg0: i32, %arg1: memref<32x64xbf16, #tpu.memory_space<vmem>>, %arg2: memref<64x128xbf16, #tpu.memory_space<vmem>>, %arg3: memref<32x128xbf16, #tpu.memory_space<vmem>>, %arg4: memref<1x128xf32, #tpu.memory_space<vmem>>, %arg5: memref<2x32xf32, #tpu.memory_space<vmem>>, %arg6: memref<32x128xf32, #tpu.memory_space<vmem>>) attributes {dimension_semantics = [#tpu.dimension_semantics<arbitrary>], iteration_bounds = array<i64: 1>, scalar_prefetch = 0 : i64, scratch_operands = 1 : i64, tpu.core_type = #tpu.core_type<tc>, window_params = [{pipeline_mode = #tpu.pipeline_mode<synchronous>, transform_indices = @transform_0, window_bounds = array<i64: 32, 64>}, {pipeline_mode = #tpu.pipeline_mode<synchronous>, transform_indices = @transform_1, window_bounds = array<i64: 64, 128>}, {pipeline_mode = #tpu.pipeline_mode<synchronous>, transform_indices = @transform_2, window_bounds = array<i64: 32, 128>}, {pipeline_mode = #tpu.pipeline_mode<synchronous>, transform_indices = @transform_3, window_bounds = array<i64: 1, 128>}, {pipeline_mode = #tpu.pipeline_mode<synchronous>, transform_indices = @transform_4, window_bounds = array<i64: 2, 32>}]} {
    %c0 = arith.constant 0 : index
    %c0_0 = arith.constant 0 : index
    %0 = vector.load %arg1[%c0, %c0_0] : memref<32x64xbf16, #tpu.memory_space<vmem>>, vector<32x64xbf16>
    %c0_1 = arith.constant 0 : index
    %c0_2 = arith.constant 0 : index
    %1 = vector.load %arg2[%c0_1, %c0_2] : memref<64x128xbf16, #tpu.memory_space<vmem>>, vector<64x128xbf16>
    %cst = arith.constant dense<0.000000e+00> : vector<32x128xf32>
    %2 = tpu.matmul %0, %1, %cst {dimension_numbers = #tpu.dot_dimension_numbers<[1], [0], [0], [1], [0, 0, 1, 1], [], []>} : vector<32x64xbf16>, vector<64x128xbf16>, vector<32x128xf32> -> vector<32x128xf32>
    %c0_3 = arith.constant 0 : index
    %c0_4 = arith.constant 0 : index
    %3 = vector.load %arg4[%c0_3, %c0_4] : memref<1x128xf32, #tpu.memory_space<vmem>>, vector<1x128xf32>
    %4 = vector.broadcast %3 : vector<1x128xf32> to vector<32x128xf32>
    %5 = arith.addf %2, %4 : vector<32x128xf32>
    %c0_5 = arith.constant 0 : index
    %c0_6 = arith.constant 0 : index
    %6 = vector.load %arg6[%c0_5, %c0_6] : memref<32x128xf32, #tpu.memory_space<vmem>>, vector<32x128xf32>
    tpu.vector_store %arg6[%c0_5, %c0_6], %5 {strides = array<i32>} : memref<32x128xf32, #tpu.memory_space<vmem>>, vector<32x128xf32>,
    %c0_7 = arith.constant 0 : index
    %c0_8 = arith.constant 0 : index
    %7 = vector.load %arg3[%c0_7, %c0_8] : memref<32x128xbf16, #tpu.memory_space<vmem>>, vector<32x128xbf16>
    %8 = tpu.iota {dimensions = array<i32: 1>} : vector<1x128xi32>
    %c96_i32 = arith.constant 96 : i32
    %9 = vector.broadcast %c96_i32 : i32 to vector<1x128xi32>
    %10 = arith.cmpi slt, %8, %9 : vector<1x128xi32>
    %cst_9 = arith.constant 5.000000e-01 : f32
    %cst_10 = arith.constant 1.000000e+00 : f32
    %11 = vector.broadcast %cst_9 : f32 to vector<1x128xf32>
    %12 = vector.broadcast %cst_10 : f32 to vector<1x128xf32>
    %13 = arith.select %10, %11, %12 : vector<1x128xi1>, vector<1x128xf32>
    %cst_11 = arith.constant 5.000000e-01 : f32
    %cst_12 = arith.constant 0.000000e+00 : f32
    %14 = vector.broadcast %cst_11 : f32 to vector<1x128xf32>
    %15 = vector.broadcast %cst_12 : f32 to vector<1x128xf32>
    %16 = arith.select %10, %14, %15 : vector<1x128xi1>, vector<1x128xf32>
    %cst_13 = arith.constant 0.000000e+00 : f32
    %17 = vector.broadcast %cst_13 : f32 to vector<2x32xf32>
    %cst_14 = arith.constant 0.000000e+00 : f32
    %18 = vector.broadcast %cst_14 : f32 to vector<2x32xf32>
    %c0_i32 = arith.constant 0 : i32
    %c2_i32 = arith.constant 2 : i32
    %19 = arith.muli %c0_i32, %c2_i32 : i32
    %20 = arith.index_cast %19 : i32 to index
    %c0_15 = arith.constant 0 : index
    %21 = vector.load %arg6[%20, %c0_15] : memref<32x128xf32, #tpu.memory_space<vmem>>, vector<2x128xf32>
    %22 = arith.truncf %17 : vector<2x32xf32> to vector<2x32xbf16>
    %cst_16 = arith.constant dense<0.000000e+00> : vector<2x128xf32>
    %23 = tpu.matmul %22, %7, %cst_16 {dimension_numbers = #tpu.dot_dimension_numbers<[1], [0], [0], [1], [0, 0, 1, 1], [], []>} : vector<2x32xbf16>, vector<32x128xbf16>, vector<2x128xf32> -> vector<2x128xf32>
    %24 = arith.addf %21, %23 : vector<2x128xf32>
    %25 = math.tanh %24 : vector<2x128xf32>
    %26 = vector.broadcast %13 : vector<1x128xf32> to vector<2x128xf32>
    %27 = arith.mulf %25, %26 : vector<2x128xf32>
    %28 = vector.broadcast %16 : vector<1x128xf32> to vector<2x128xf32>
    %29 = arith.addf %27, %28 : vector<2x128xf32>
    %30 = vector.extract_strided_slice %29 {offsets = [0, 0], sizes = [2, 32], strides = [1, 1]} : vector<2x128xf32> to vector<2x32xf32>
    %31 = vector.extract_strided_slice %29 {offsets = [0, 32], sizes = [2, 32], strides = [1, 1]} : vector<2x128xf32> to vector<2x32xf32>
    %32 = vector.extract_strided_slice %29 {offsets = [0, 64], sizes = [2, 32], strides = [1, 1]} : vector<2x128xf32> to vector<2x32xf32>
    %33 = vector.extract_strided_slice %29 {offsets = [0, 96], sizes = [2, 32], strides = [1, 1]} : vector<2x128xf32> to vector<2x32xf32>
    %34 = arith.mulf %31, %18 : vector<2x32xf32>
    %35 = arith.mulf %30, %33 : vector<2x32xf32>
    %36 = arith.addf %34, %35 : vector<2x32xf32>
    %37 = math.tanh %36 : vector<2x32xf32>
    %38 = arith.mulf %32, %37 : vector<2x32xf32>
    %c1_i32 = arith.constant 1 : i32
    %c2_i32_17 = arith.constant 2 : i32
    %39 = arith.muli %c1_i32, %c2_i32_17 : i32
    %40 = arith.index_cast %39 : i32 to index
    %c0_18 = arith.constant 0 : index
    %41 = vector.load %arg6[%40, %c0_18] : memref<32x128xf32, #tpu.memory_space<vmem>>, vector<2x128xf32>
    %42 = arith.truncf %38 : vector<2x32xf32> to vector<2x32xbf16>
    %cst_19 = arith.constant dense<0.000000e+00> : vector<2x128xf32>
    %43 = tpu.matmul %42, %7, %cst_19 {dimension_numbers = #tpu.dot_dimension_numbers<[1], [0], [0], [1], [0, 0, 1, 1], [], []>} : vector<2x32xbf16>, vector<32x128xbf16>, vector<2x128xf32> -> vector<2x128xf32>
    %44 = arith.addf %41, %43 : vector<2x128xf32>
    %45 = math.tanh %44 : vector<2x128xf32>
    %46 = vector.broadcast %13 : vector<1x128xf32> to vector<2x128xf32>
    %47 = arith.mulf %45, %46 : vector<2x128xf32>
    %48 = vector.broadcast %16 : vector<1x128xf32> to vector<2x128xf32>
    %49 = arith.addf %47, %48 : vector<2x128xf32>
    %50 = vector.extract_strided_slice %49 {offsets = [0, 0], sizes = [2, 32], strides = [1, 1]} : vector<2x128xf32> to vector<2x32xf32>
    %51 = vector.extract_strided_slice %49 {offsets = [0, 32], sizes = [2, 32], strides = [1, 1]} : vector<2x128xf32> to vector<2x32xf32>
    %52 = vector.extract_strided_slice %49 {offsets = [0, 64], sizes = [2, 32], strides = [1, 1]} : vector<2x128xf32> to vector<2x32xf32>
    %53 = vector.extract_strided_slice %49 {offsets = [0, 96], sizes = [2, 32], strides = [1, 1]} : vector<2x128xf32> to vector<2x32xf32>
    %54 = arith.mulf %51, %36 : vector<2x32xf32>
    %55 = arith.mulf %50, %53 : vector<2x32xf32>
    %56 = arith.addf %54, %55 : vector<2x32xf32>
    %57 = math.tanh %56 : vector<2x32xf32>
    %58 = arith.mulf %52, %57 : vector<2x32xf32>
    %c2_i32_20 = arith.constant 2 : i32
    %c2_i32_21 = arith.constant 2 : i32
    %59 = arith.muli %c2_i32_20, %c2_i32_21 : i32
    %60 = arith.index_cast %59 : i32 to index
    %c0_22 = arith.constant 0 : index
    %61 = vector.load %arg6[%60, %c0_22] : memref<32x128xf32, #tpu.memory_space<vmem>>, vector<2x128xf32>
    %62 = arith.truncf %58 : vector<2x32xf32> to vector<2x32xbf16>
    %cst_23 = arith.constant dense<0.000000e+00> : vector<2x128xf32>
    %63 = tpu.matmul %62, %7, %cst_23 {dimension_numbers = #tpu.dot_dimension_numbers<[1], [0], [0], [1], [0, 0, 1, 1], [], []>} : vector<2x32xbf16>, vector<32x128xbf16>, vector<2x128xf32> -> vector<2x128xf32>
    %64 = arith.addf %61, %63 : vector<2x128xf32>
    %65 = math.tanh %64 : vector<2x128xf32>
    %66 = vector.broadcast %13 : vector<1x128xf32> to vector<2x128xf32>
    %67 = arith.mulf %65, %66 : vector<2x128xf32>
    %68 = vector.broadcast %16 : vector<1x128xf32> to vector<2x128xf32>
    %69 = arith.addf %67, %68 : vector<2x128xf32>
    %70 = vector.extract_strided_slice %69 {offsets = [0, 0], sizes = [2, 32], strides = [1, 1]} : vector<2x128xf32> to vector<2x32xf32>
    %71 = vector.extract_strided_slice %69 {offsets = [0, 32], sizes = [2, 32], strides = [1, 1]} : vector<2x128xf32> to vector<2x32xf32>
    %72 = vector.extract_strided_slice %69 {offsets = [0, 64], sizes = [2, 32], strides = [1, 1]} : vector<2x128xf32> to vector<2x32xf32>
    %73 = vector.extract_strided_slice %69 {offsets = [0, 96], sizes = [2, 32], strides = [1, 1]} : vector<2x128xf32> to vector<2x32xf32>
    %74 = arith.mulf %71, %56 : vector<2x32xf32>
    %75 = arith.mulf %70, %73 : vector<2x32xf32>
    %76 = arith.addf %74, %75 : vector<2x32xf32>
    %77 = math.tanh %76 : vector<2x32xf32>
    %78 = arith.mulf %72, %77 : vector<2x32xf32>
    %c3_i32 = arith.constant 3 : i32
    %c2_i32_24 = arith.constant 2 : i32
    %79 = arith.muli %c3_i32, %c2_i32_24 : i32
    %80 = arith.index_cast %79 : i32 to index
    %c0_25 = arith.constant 0 : index
    %81 = vector.load %arg6[%80, %c0_25] : memref<32x128xf32, #tpu.memory_space<vmem>>, vector<2x128xf32>
    %82 = arith.truncf %78 : vector<2x32xf32> to vector<2x32xbf16>
    %cst_26 = arith.constant dense<0.000000e+00> : vector<2x128xf32>
    %83 = tpu.matmul %82, %7, %cst_26 {dimension_numbers = #tpu.dot_dimension_numbers<[1], [0], [0], [1], [0, 0, 1, 1], [], []>} : vector<2x32xbf16>, vector<32x128xbf16>, vector<2x128xf32> -> vector<2x128xf32>
    %84 = arith.addf %81, %83 : vector<2x128xf32>
    %85 = math.tanh %84 : vector<2x128xf32>
    %86 = vector.broadcast %13 : vector<1x128xf32> to vector<2x128xf32>
    %87 = arith.mulf %85, %86 : vector<2x128xf32>
    %88 = vector.broadcast %16 : vector<1x128xf32> to vector<2x128xf32>
    %89 = arith.addf %87, %88 : vector<2x128xf32>
    %90 = vector.extract_strided_slice %89 {offsets = [0, 0], sizes = [2, 32], strides = [1, 1]} : vector<2x128xf32> to vector<2x32xf32>
    %91 = vector.extract_strided_slice %89 {offsets = [0, 32], sizes = [2, 32], strides = [1, 1]} : vector<2x128xf32> to vector<2x32xf32>
    %92 = vector.extract_strided_slice %89 {offsets = [0, 64], sizes = [2, 32], strides = [1, 1]} : vector<2x128xf32> to vector<2x32xf32>
    %93 = vector.extract_strided_slice %89 {offsets = [0, 96], sizes = [2, 32], strides = [1, 1]} : vector<2x128xf32> to vector<2x32xf32>
    %94 = arith.mulf %91, %76 : vector<2x32xf32>
    %95 = arith.mulf %90, %93 : vector<2x32xf32>
    %96 = arith.addf %94, %95 : vector<2x32xf32>
    %97 = math.tanh %96 : vector<2x32xf32>
    %98 = arith.mulf %92, %97 : vector<2x32xf32>
    %c4_i32 = arith.constant 4 : i32
    %c2_i32_27 = arith.constant 2 : i32
    %99 = arith.muli %c4_i32, %c2_i32_27 : i32
    %100 = arith.index_cast %99 : i32 to index
    %c0_28 = arith.constant 0 : index
    %101 = vector.load %arg6[%100, %c0_28] : memref<32x128xf32, #tpu.memory_space<vmem>>, vector<2x128xf32>
    %102 = arith.truncf %98 : vector<2x32xf32> to vector<2x32xbf16>
    %cst_29 = arith.constant dense<0.000000e+00> : vector<2x128xf32>
    %103 = tpu.matmul %102, %7, %cst_29 {dimension_numbers = #tpu.dot_dimension_numbers<[1], [0], [0], [1], [0, 0, 1, 1], [], []>} : vector<2x32xbf16>, vector<32x128xbf16>, vector<2x128xf32> -> vector<2x128xf32>
    %104 = arith.addf %101, %103 : vector<2x128xf32>
    %105 = math.tanh %104 : vector<2x128xf32>
    %106 = vector.broadcast %13 : vector<1x128xf32> to vector<2x128xf32>
    %107 = arith.mulf %105, %106 : vector<2x128xf32>
    %108 = vector.broadcast %16 : vector<1x128xf32> to vector<2x128xf32>
    %109 = arith.addf %107, %108 : vector<2x128xf32>
    %110 = vector.extract_strided_slice %109 {offsets = [0, 0], sizes = [2, 32], strides = [1, 1]} : vector<2x128xf32> to vector<2x32xf32>
    %111 = vector.extract_strided_slice %109 {offsets = [0, 32], sizes = [2, 32], strides = [1, 1]} : vector<2x128xf32> to vector<2x32xf32>
    %112 = vector.extract_strided_slice %109 {offsets = [0, 64], sizes = [2, 32], strides = [1, 1]} : vector<2x128xf32> to vector<2x32xf32>
    %113 = vector.extract_strided_slice %109 {offsets = [0, 96], sizes = [2, 32], strides = [1, 1]} : vector<2x128xf32> to vector<2x32xf32>
    %114 = arith.mulf %111, %96 : vector<2x32xf32>
    %115 = arith.mulf %110, %113 : vector<2x32xf32>
    %116 = arith.addf %114, %115 : vector<2x32xf32>
    %117 = math.tanh %116 : vector<2x32xf32>
    %118 = arith.mulf %112, %117 : vector<2x32xf32>
    %c5_i32 = arith.constant 5 : i32
    %c2_i32_30 = arith.constant 2 : i32
    %119 = arith.muli %c5_i32, %c2_i32_30 : i32
    %120 = arith.index_cast %119 : i32 to index
    %c0_31 = arith.constant 0 : index
    %121 = vector.load %arg6[%120, %c0_31] : memref<32x128xf32, #tpu.memory_space<vmem>>, vector<2x128xf32>
    %122 = arith.truncf %118 : vector<2x32xf32> to vector<2x32xbf16>
    %cst_32 = arith.constant dense<0.000000e+00> : vector<2x128xf32>
    %123 = tpu.matmul %122, %7, %cst_32 {dimension_numbers = #tpu.dot_dimension_numbers<[1], [0], [0], [1], [0, 0, 1, 1], [], []>} : vector<2x32xbf16>, vector<32x128xbf16>, vector<2x128xf32> -> vector<2x128xf32>
    %124 = arith.addf %121, %123 : vector<2x128xf32>
    %125 = math.tanh %124 : vector<2x128xf32>
    %126 = vector.broadcast %13 : vector<1x128xf32> to vector<2x128xf32>
    %127 = arith.mulf %125, %126 : vector<2x128xf32>
    %128 = vector.broadcast %16 : vector<1x128xf32> to vector<2x128xf32>
    %129 = arith.addf %127, %128 : vector<2x128xf32>
    %130 = vector.extract_strided_slice %129 {offsets = [0, 0], sizes = [2, 32], strides = [1, 1]} : vector<2x128xf32> to vector<2x32xf32>
    %131 = vector.extract_strided_slice %129 {offsets = [0, 32], sizes = [2, 32], strides = [1, 1]} : vector<2x128xf32> to vector<2x32xf32>
    %132 = vector.extract_strided_slice %129 {offsets = [0, 64], sizes = [2, 32], strides = [1, 1]} : vector<2x128xf32> to vector<2x32xf32>
    %133 = vector.extract_strided_slice %129 {offsets = [0, 96], sizes = [2, 32], strides = [1, 1]} : vector<2x128xf32> to vector<2x32xf32>
    %134 = arith.mulf %131, %116 : vector<2x32xf32>
    %135 = arith.mulf %130, %133 : vector<2x32xf32>
    %136 = arith.addf %134, %135 : vector<2x32xf32>
    %137 = math.tanh %136 : vector<2x32xf32>
    %138 = arith.mulf %132, %137 : vector<2x32xf32>
    %c6_i32 = arith.constant 6 : i32
    %c2_i32_33 = arith.constant 2 : i32
    %139 = arith.muli %c6_i32, %c2_i32_33 : i32
    %140 = arith.index_cast %139 : i32 to index
    %c0_34 = arith.constant 0 : index
    %141 = vector.load %arg6[%140, %c0_34] : memref<32x128xf32, #tpu.memory_space<vmem>>, vector<2x128xf32>
    %142 = arith.truncf %138 : vector<2x32xf32> to vector<2x32xbf16>
    %cst_35 = arith.constant dense<0.000000e+00> : vector<2x128xf32>
    %143 = tpu.matmul %142, %7, %cst_35 {dimension_numbers = #tpu.dot_dimension_numbers<[1], [0], [0], [1], [0, 0, 1, 1], [], []>} : vector<2x32xbf16>, vector<32x128xbf16>, vector<2x128xf32> -> vector<2x128xf32>
    %144 = arith.addf %141, %143 : vector<2x128xf32>
    %145 = math.tanh %144 : vector<2x128xf32>
    %146 = vector.broadcast %13 : vector<1x128xf32> to vector<2x128xf32>
    %147 = arith.mulf %145, %146 : vector<2x128xf32>
    %148 = vector.broadcast %16 : vector<1x128xf32> to vector<2x128xf32>
    %149 = arith.addf %147, %148 : vector<2x128xf32>
    %150 = vector.extract_strided_slice %149 {offsets = [0, 0], sizes = [2, 32], strides = [1, 1]} : vector<2x128xf32> to vector<2x32xf32>
    %151 = vector.extract_strided_slice %149 {offsets = [0, 32], sizes = [2, 32], strides = [1, 1]} : vector<2x128xf32> to vector<2x32xf32>
    %152 = vector.extract_strided_slice %149 {offsets = [0, 64], sizes = [2, 32], strides = [1, 1]} : vector<2x128xf32> to vector<2x32xf32>
    %153 = vector.extract_strided_slice %149 {offsets = [0, 96], sizes = [2, 32], strides = [1, 1]} : vector<2x128xf32> to vector<2x32xf32>
    %154 = arith.mulf %151, %136 : vector<2x32xf32>
    %155 = arith.mulf %150, %153 : vector<2x32xf32>
    %156 = arith.addf %154, %155 : vector<2x32xf32>
    %157 = math.tanh %156 : vector<2x32xf32>
    %158 = arith.mulf %152, %157 : vector<2x32xf32>
    %c7_i32 = arith.constant 7 : i32
    %c2_i32_36 = arith.constant 2 : i32
    %159 = arith.muli %c7_i32, %c2_i32_36 : i32
    %160 = arith.index_cast %159 : i32 to index
    %c0_37 = arith.constant 0 : index
    %161 = vector.load %arg6[%160, %c0_37] : memref<32x128xf32, #tpu.memory_space<vmem>>, vector<2x128xf32>
    %162 = arith.truncf %158 : vector<2x32xf32> to vector<2x32xbf16>
    %cst_38 = arith.constant dense<0.000000e+00> : vector<2x128xf32>
    %163 = tpu.matmul %162, %7, %cst_38 {dimension_numbers = #tpu.dot_dimension_numbers<[1], [0], [0], [1], [0, 0, 1, 1], [], []>} : vector<2x32xbf16>, vector<32x128xbf16>, vector<2x128xf32> -> vector<2x128xf32>
    %164 = arith.addf %161, %163 : vector<2x128xf32>
    %165 = math.tanh %164 : vector<2x128xf32>
    %166 = vector.broadcast %13 : vector<1x128xf32> to vector<2x128xf32>
    %167 = arith.mulf %165, %166 : vector<2x128xf32>
    %168 = vector.broadcast %16 : vector<1x128xf32> to vector<2x128xf32>
    %169 = arith.addf %167, %168 : vector<2x128xf32>
    %170 = vector.extract_strided_slice %169 {offsets = [0, 0], sizes = [2, 32], strides = [1, 1]} : vector<2x128xf32> to vector<2x32xf32>
    %171 = vector.extract_strided_slice %169 {offsets = [0, 32], sizes = [2, 32], strides = [1, 1]} : vector<2x128xf32> to vector<2x32xf32>
    %172 = vector.extract_strided_slice %169 {offsets = [0, 64], sizes = [2, 32], strides = [1, 1]} : vector<2x128xf32> to vector<2x32xf32>
    %173 = vector.extract_strided_slice %169 {offsets = [0, 96], sizes = [2, 32], strides = [1, 1]} : vector<2x128xf32> to vector<2x32xf32>
    %174 = arith.mulf %171, %156 : vector<2x32xf32>
    %175 = arith.mulf %170, %173 : vector<2x32xf32>
    %176 = arith.addf %174, %175 : vector<2x32xf32>
    %177 = math.tanh %176 : vector<2x32xf32>
    %178 = arith.mulf %172, %177 : vector<2x32xf32>
    %c8_i32 = arith.constant 8 : i32
    %c2_i32_39 = arith.constant 2 : i32
    %179 = arith.muli %c8_i32, %c2_i32_39 : i32
    %180 = arith.index_cast %179 : i32 to index
    %c0_40 = arith.constant 0 : index
    %181 = vector.load %arg6[%180, %c0_40] : memref<32x128xf32, #tpu.memory_space<vmem>>, vector<2x128xf32>
    %182 = arith.truncf %178 : vector<2x32xf32> to vector<2x32xbf16>
    %cst_41 = arith.constant dense<0.000000e+00> : vector<2x128xf32>
    %183 = tpu.matmul %182, %7, %cst_41 {dimension_numbers = #tpu.dot_dimension_numbers<[1], [0], [0], [1], [0, 0, 1, 1], [], []>} : vector<2x32xbf16>, vector<32x128xbf16>, vector<2x128xf32> -> vector<2x128xf32>
    %184 = arith.addf %181, %183 : vector<2x128xf32>
    %185 = math.tanh %184 : vector<2x128xf32>
    %186 = vector.broadcast %13 : vector<1x128xf32> to vector<2x128xf32>
    %187 = arith.mulf %185, %186 : vector<2x128xf32>
    %188 = vector.broadcast %16 : vector<1x128xf32> to vector<2x128xf32>
    %189 = arith.addf %187, %188 : vector<2x128xf32>
    %190 = vector.extract_strided_slice %189 {offsets = [0, 0], sizes = [2, 32], strides = [1, 1]} : vector<2x128xf32> to vector<2x32xf32>
    %191 = vector.extract_strided_slice %189 {offsets = [0, 32], sizes = [2, 32], strides = [1, 1]} : vector<2x128xf32> to vector<2x32xf32>
    %192 = vector.extract_strided_slice %189 {offsets = [0, 64], sizes = [2, 32], strides = [1, 1]} : vector<2x128xf32> to vector<2x32xf32>
    %193 = vector.extract_strided_slice %189 {offsets = [0, 96], sizes = [2, 32], strides = [1, 1]} : vector<2x128xf32> to vector<2x32xf32>
    %194 = arith.mulf %191, %176 : vector<2x32xf32>
    %195 = arith.mulf %190, %193 : vector<2x32xf32>
    %196 = arith.addf %194, %195 : vector<2x32xf32>
    %197 = math.tanh %196 : vector<2x32xf32>
    %198 = arith.mulf %192, %197 : vector<2x32xf32>
    %c9_i32 = arith.constant 9 : i32
    %c2_i32_42 = arith.constant 2 : i32
    %199 = arith.muli %c9_i32, %c2_i32_42 : i32
    %200 = arith.index_cast %199 : i32 to index
    %c0_43 = arith.constant 0 : index
    %201 = vector.load %arg6[%200, %c0_43] : memref<32x128xf32, #tpu.memory_space<vmem>>, vector<2x128xf32>
    %202 = arith.truncf %198 : vector<2x32xf32> to vector<2x32xbf16>
    %cst_44 = arith.constant dense<0.000000e+00> : vector<2x128xf32>
    %203 = tpu.matmul %202, %7, %cst_44 {dimension_numbers = #tpu.dot_dimension_numbers<[1], [0], [0], [1], [0, 0, 1, 1], [], []>} : vector<2x32xbf16>, vector<32x128xbf16>, vector<2x128xf32> -> vector<2x128xf32>
    %204 = arith.addf %201, %203 : vector<2x128xf32>
    %205 = math.tanh %204 : vector<2x128xf32>
    %206 = vector.broadcast %13 : vector<1x128xf32> to vector<2x128xf32>
    %207 = arith.mulf %205, %206 : vector<2x128xf32>
    %208 = vector.broadcast %16 : vector<1x128xf32> to vector<2x128xf32>
    %209 = arith.addf %207, %208 : vector<2x128xf32>
    %210 = vector.extract_strided_slice %209 {offsets = [0, 0], sizes = [2, 32], strides = [1, 1]} : vector<2x128xf32> to vector<2x32xf32>
    %211 = vector.extract_strided_slice %209 {offsets = [0, 32], sizes = [2, 32], strides = [1, 1]} : vector<2x128xf32> to vector<2x32xf32>
    %212 = vector.extract_strided_slice %209 {offsets = [0, 64], sizes = [2, 32], strides = [1, 1]} : vector<2x128xf32> to vector<2x32xf32>
    %213 = vector.extract_strided_slice %209 {offsets = [0, 96], sizes = [2, 32], strides = [1, 1]} : vector<2x128xf32> to vector<2x32xf32>
    %214 = arith.mulf %211, %196 : vector<2x32xf32>
    %215 = arith.mulf %210, %213 : vector<2x32xf32>
    %216 = arith.addf %214, %215 : vector<2x32xf32>
    %217 = math.tanh %216 : vector<2x32xf32>
    %218 = arith.mulf %212, %217 : vector<2x32xf32>
    %c10_i32 = arith.constant 10 : i32
    %c2_i32_45 = arith.constant 2 : i32
    %219 = arith.muli %c10_i32, %c2_i32_45 : i32
    %220 = arith.index_cast %219 : i32 to index
    %c0_46 = arith.constant 0 : index
    %221 = vector.load %arg6[%220, %c0_46] : memref<32x128xf32, #tpu.memory_space<vmem>>, vector<2x128xf32>
    %222 = arith.truncf %218 : vector<2x32xf32> to vector<2x32xbf16>
    %cst_47 = arith.constant dense<0.000000e+00> : vector<2x128xf32>
    %223 = tpu.matmul %222, %7, %cst_47 {dimension_numbers = #tpu.dot_dimension_numbers<[1], [0], [0], [1], [0, 0, 1, 1], [], []>} : vector<2x32xbf16>, vector<32x128xbf16>, vector<2x128xf32> -> vector<2x128xf32>
    %224 = arith.addf %221, %223 : vector<2x128xf32>
    %225 = math.tanh %224 : vector<2x128xf32>
    %226 = vector.broadcast %13 : vector<1x128xf32> to vector<2x128xf32>
    %227 = arith.mulf %225, %226 : vector<2x128xf32>
    %228 = vector.broadcast %16 : vector<1x128xf32> to vector<2x128xf32>
    %229 = arith.addf %227, %228 : vector<2x128xf32>
    %230 = vector.extract_strided_slice %229 {offsets = [0, 0], sizes = [2, 32], strides = [1, 1]} : vector<2x128xf32> to vector<2x32xf32>
    %231 = vector.extract_strided_slice %229 {offsets = [0, 32], sizes = [2, 32], strides = [1, 1]} : vector<2x128xf32> to vector<2x32xf32>
    %232 = vector.extract_strided_slice %229 {offsets = [0, 64], sizes = [2, 32], strides = [1, 1]} : vector<2x128xf32> to vector<2x32xf32>
    %233 = vector.extract_strided_slice %229 {offsets = [0, 96], sizes = [2, 32], strides = [1, 1]} : vector<2x128xf32> to vector<2x32xf32>
    %234 = arith.mulf %231, %216 : vector<2x32xf32>
    %235 = arith.mulf %230, %233 : vector<2x32xf32>
    %236 = arith.addf %234, %235 : vector<2x32xf32>
    %237 = math.tanh %236 : vector<2x32xf32>
    %238 = arith.mulf %232, %237 : vector<2x32xf32>
    %c11_i32 = arith.constant 11 : i32
    %c2_i32_48 = arith.constant 2 : i32
    %239 = arith.muli %c11_i32, %c2_i32_48 : i32
    %240 = arith.index_cast %239 : i32 to index
    %c0_49 = arith.constant 0 : index
    %241 = vector.load %arg6[%240, %c0_49] : memref<32x128xf32, #tpu.memory_space<vmem>>, vector<2x128xf32>
    %242 = arith.truncf %238 : vector<2x32xf32> to vector<2x32xbf16>
    %cst_50 = arith.constant dense<0.000000e+00> : vector<2x128xf32>
    %243 = tpu.matmul %242, %7, %cst_50 {dimension_numbers = #tpu.dot_dimension_numbers<[1], [0], [0], [1], [0, 0, 1, 1], [], []>} : vector<2x32xbf16>, vector<32x128xbf16>, vector<2x128xf32> -> vector<2x128xf32>
    %244 = arith.addf %241, %243 : vector<2x128xf32>
    %245 = math.tanh %244 : vector<2x128xf32>
    %246 = vector.broadcast %13 : vector<1x128xf32> to vector<2x128xf32>
    %247 = arith.mulf %245, %246 : vector<2x128xf32>
    %248 = vector.broadcast %16 : vector<1x128xf32> to vector<2x128xf32>
    %249 = arith.addf %247, %248 : vector<2x128xf32>
    %250 = vector.extract_strided_slice %249 {offsets = [0, 0], sizes = [2, 32], strides = [1, 1]} : vector<2x128xf32> to vector<2x32xf32>
    %251 = vector.extract_strided_slice %249 {offsets = [0, 32], sizes = [2, 32], strides = [1, 1]} : vector<2x128xf32> to vector<2x32xf32>
    %252 = vector.extract_strided_slice %249 {offsets = [0, 64], sizes = [2, 32], strides = [1, 1]} : vector<2x128xf32> to vector<2x32xf32>
    %253 = vector.extract_strided_slice %249 {offsets = [0, 96], sizes = [2, 32], strides = [1, 1]} : vector<2x128xf32> to vector<2x32xf32>
    %254 = arith.mulf %251, %236 : vector<2x32xf32>
    %255 = arith.mulf %250, %253 : vector<2x32xf32>
    %256 = arith.addf %254, %255 : vector<2x32xf32>
    %257 = math.tanh %256 : vector<2x32xf32>
    %258 = arith.mulf %252, %257 : vector<2x32xf32>
    %c12_i32 = arith.constant 12 : i32
    %c2_i32_51 = arith.constant 2 : i32
    %259 = arith.muli %c12_i32, %c2_i32_51 : i32
    %260 = arith.index_cast %259 : i32 to index
    %c0_52 = arith.constant 0 : index
    %261 = vector.load %arg6[%260, %c0_52] : memref<32x128xf32, #tpu.memory_space<vmem>>, vector<2x128xf32>
    %262 = arith.truncf %258 : vector<2x32xf32> to vector<2x32xbf16>
    %cst_53 = arith.constant dense<0.000000e+00> : vector<2x128xf32>
    %263 = tpu.matmul %262, %7, %cst_53 {dimension_numbers = #tpu.dot_dimension_numbers<[1], [0], [0], [1], [0, 0, 1, 1], [], []>} : vector<2x32xbf16>, vector<32x128xbf16>, vector<2x128xf32> -> vector<2x128xf32>
    %264 = arith.addf %261, %263 : vector<2x128xf32>
    %265 = math.tanh %264 : vector<2x128xf32>
    %266 = vector.broadcast %13 : vector<1x128xf32> to vector<2x128xf32>
    %267 = arith.mulf %265, %266 : vector<2x128xf32>
    %268 = vector.broadcast %16 : vector<1x128xf32> to vector<2x128xf32>
    %269 = arith.addf %267, %268 : vector<2x128xf32>
    %270 = vector.extract_strided_slice %269 {offsets = [0, 0], sizes = [2, 32], strides = [1, 1]} : vector<2x128xf32> to vector<2x32xf32>
    %271 = vector.extract_strided_slice %269 {offsets = [0, 32], sizes = [2, 32], strides = [1, 1]} : vector<2x128xf32> to vector<2x32xf32>
    %272 = vector.extract_strided_slice %269 {offsets = [0, 64], sizes = [2, 32], strides = [1, 1]} : vector<2x128xf32> to vector<2x32xf32>
    %273 = vector.extract_strided_slice %269 {offsets = [0, 96], sizes = [2, 32], strides = [1, 1]} : vector<2x128xf32> to vector<2x32xf32>
    %274 = arith.mulf %271, %256 : vector<2x32xf32>
    %275 = arith.mulf %270, %273 : vector<2x32xf32>
    %276 = arith.addf %274, %275 : vector<2x32xf32>
    %277 = math.tanh %276 : vector<2x32xf32>
    %278 = arith.mulf %272, %277 : vector<2x32xf32>
    %c13_i32 = arith.constant 13 : i32
    %c2_i32_54 = arith.constant 2 : i32
    %279 = arith.muli %c13_i32, %c2_i32_54 : i32
    %280 = arith.index_cast %279 : i32 to index
    %c0_55 = arith.constant 0 : index
    %281 = vector.load %arg6[%280, %c0_55] : memref<32x128xf32, #tpu.memory_space<vmem>>, vector<2x128xf32>
    %282 = arith.truncf %278 : vector<2x32xf32> to vector<2x32xbf16>
    %cst_56 = arith.constant dense<0.000000e+00> : vector<2x128xf32>
    %283 = tpu.matmul %282, %7, %cst_56 {dimension_numbers = #tpu.dot_dimension_numbers<[1], [0], [0], [1], [0, 0, 1, 1], [], []>} : vector<2x32xbf16>, vector<32x128xbf16>, vector<2x128xf32> -> vector<2x128xf32>
    %284 = arith.addf %281, %283 : vector<2x128xf32>
    %285 = math.tanh %284 : vector<2x128xf32>
    %286 = vector.broadcast %13 : vector<1x128xf32> to vector<2x128xf32>
    %287 = arith.mulf %285, %286 : vector<2x128xf32>
    %288 = vector.broadcast %16 : vector<1x128xf32> to vector<2x128xf32>
    %289 = arith.addf %287, %288 : vector<2x128xf32>
    %290 = vector.extract_strided_slice %289 {offsets = [0, 0], sizes = [2, 32], strides = [1, 1]} : vector<2x128xf32> to vector<2x32xf32>
    %291 = vector.extract_strided_slice %289 {offsets = [0, 32], sizes = [2, 32], strides = [1, 1]} : vector<2x128xf32> to vector<2x32xf32>
    %292 = vector.extract_strided_slice %289 {offsets = [0, 64], sizes = [2, 32], strides = [1, 1]} : vector<2x128xf32> to vector<2x32xf32>
    %293 = vector.extract_strided_slice %289 {offsets = [0, 96], sizes = [2, 32], strides = [1, 1]} : vector<2x128xf32> to vector<2x32xf32>
    %294 = arith.mulf %291, %276 : vector<2x32xf32>
    %295 = arith.mulf %290, %293 : vector<2x32xf32>
    %296 = arith.addf %294, %295 : vector<2x32xf32>
    %297 = math.tanh %296 : vector<2x32xf32>
    %298 = arith.mulf %292, %297 : vector<2x32xf32>
    %c14_i32 = arith.constant 14 : i32
    %c2_i32_57 = arith.constant 2 : i32
    %299 = arith.muli %c14_i32, %c2_i32_57 : i32
    %300 = arith.index_cast %299 : i32 to index
    %c0_58 = arith.constant 0 : index
    %301 = vector.load %arg6[%300, %c0_58] : memref<32x128xf32, #tpu.memory_space<vmem>>, vector<2x128xf32>
    %302 = arith.truncf %298 : vector<2x32xf32> to vector<2x32xbf16>
    %cst_59 = arith.constant dense<0.000000e+00> : vector<2x128xf32>
    %303 = tpu.matmul %302, %7, %cst_59 {dimension_numbers = #tpu.dot_dimension_numbers<[1], [0], [0], [1], [0, 0, 1, 1], [], []>} : vector<2x32xbf16>, vector<32x128xbf16>, vector<2x128xf32> -> vector<2x128xf32>
    %304 = arith.addf %301, %303 : vector<2x128xf32>
    %305 = math.tanh %304 : vector<2x128xf32>
    %306 = vector.broadcast %13 : vector<1x128xf32> to vector<2x128xf32>
    %307 = arith.mulf %305, %306 : vector<2x128xf32>
    %308 = vector.broadcast %16 : vector<1x128xf32> to vector<2x128xf32>
    %309 = arith.addf %307, %308 : vector<2x128xf32>
    %310 = vector.extract_strided_slice %309 {offsets = [0, 0], sizes = [2, 32], strides = [1, 1]} : vector<2x128xf32> to vector<2x32xf32>
    %311 = vector.extract_strided_slice %309 {offsets = [0, 32], sizes = [2, 32], strides = [1, 1]} : vector<2x128xf32> to vector<2x32xf32>
    %312 = vector.extract_strided_slice %309 {offsets = [0, 64], sizes = [2, 32], strides = [1, 1]} : vector<2x128xf32> to vector<2x32xf32>
    %313 = vector.extract_strided_slice %309 {offsets = [0, 96], sizes = [2, 32], strides = [1, 1]} : vector<2x128xf32> to vector<2x32xf32>
    %314 = arith.mulf %311, %296 : vector<2x32xf32>
    %315 = arith.mulf %310, %313 : vector<2x32xf32>
    %316 = arith.addf %314, %315 : vector<2x32xf32>
    %317 = math.tanh %316 : vector<2x32xf32>
    %318 = arith.mulf %312, %317 : vector<2x32xf32>
    %c15_i32 = arith.constant 15 : i32
    %c2_i32_60 = arith.constant 2 : i32
    %319 = arith.muli %c15_i32, %c2_i32_60 : i32
    %320 = arith.index_cast %319 : i32 to index
    %c0_61 = arith.constant 0 : index
    %321 = vector.load %arg6[%320, %c0_61] : memref<32x128xf32, #tpu.memory_space<vmem>>, vector<2x128xf32>
    %322 = arith.truncf %318 : vector<2x32xf32> to vector<2x32xbf16>
    %cst_62 = arith.constant dense<0.000000e+00> : vector<2x128xf32>
    %323 = tpu.matmul %322, %7, %cst_62 {dimension_numbers = #tpu.dot_dimension_numbers<[1], [0], [0], [1], [0, 0, 1, 1], [], []>} : vector<2x32xbf16>, vector<32x128xbf16>, vector<2x128xf32> -> vector<2x128xf32>
    %324 = arith.addf %321, %323 : vector<2x128xf32>
    %325 = math.tanh %324 : vector<2x128xf32>
    %326 = vector.broadcast %13 : vector<1x128xf32> to vector<2x128xf32>
    %327 = arith.mulf %325, %326 : vector<2x128xf32>
    %328 = vector.broadcast %16 : vector<1x128xf32> to vector<2x128xf32>
    %329 = arith.addf %327, %328 : vector<2x128xf32>
    %330 = vector.extract_strided_slice %329 {offsets = [0, 0], sizes = [2, 32], strides = [1, 1]} : vector<2x128xf32> to vector<2x32xf32>
    %331 = vector.extract_strided_slice %329 {offsets = [0, 32], sizes = [2, 32], strides = [1, 1]} : vector<2x128xf32> to vector<2x32xf32>
    %332 = vector.extract_strided_slice %329 {offsets = [0, 64], sizes = [2, 32], strides = [1, 1]} : vector<2x128xf32> to vector<2x32xf32>
    %333 = vector.extract_strided_slice %329 {offsets = [0, 96], sizes = [2, 32], strides = [1, 1]} : vector<2x128xf32> to vector<2x32xf32>
    %334 = arith.mulf %331, %316 : vector<2x32xf32>
    %335 = arith.mulf %330, %333 : vector<2x32xf32>
    %336 = arith.addf %334, %335 : vector<2x32xf32>
    %337 = math.tanh %336 : vector<2x32xf32>
    %338 = arith.mulf %332, %337 : vector<2x32xf32>
    %c16_i32 = arith.constant 16 : i32
    %c0_63 = arith.constant 0 : index
    %c0_64 = arith.constant 0 : index
    %339 = vector.load %arg5[%c0_63, %c0_64] : memref<2x32xf32, #tpu.memory_space<vmem>>, vector<2x32xf32>
    tpu.vector_store %arg5[%c0_63, %c0_64], %338 {strides = array<i32>} : memref<2x32xf32, #tpu.memory_space<vmem>>, vector<2x32xf32>,
    return
  }
  func.func @transform_0(%arg0: i32) -> (i32, i32) {
    %c0_i32 = arith.constant 0 : i32
    %c0_i32_0 = arith.constant 0 : i32
    %c0_i32_1 = arith.constant 0 : i32
    return %c0_i32, %c0_i32_0 : i32, i32
  }
  func.func @transform_1(%arg0: i32) -> (i32, i32) {
    %c0_i32 = arith.constant 0 : i32
    %c0_i32_0 = arith.constant 0 : i32
    %c0_i32_1 = arith.constant 0 : i32
    return %c0_i32, %c0_i32_0 : i32, i32
  }
  func.func @transform_2(%arg0: i32) -> (i32, i32) {
    %c0_i32 = arith.constant 0 : i32
    %c0_i32_0 = arith.constant 0 : i32
    %c0_i32_1 = arith.constant 0 : i32
    return %c0_i32, %c0_i32_0 : i32, i32
  }
  func.func @transform_3(%arg0: i32) -> (i32, i32) {
    %c0_i32 = arith.constant 0 : i32
    %c0_i32_0 = arith.constant 0 : i32
    %c0_i32_1 = arith.constant 0 : i32
    return %c0_i32, %c0_i32_0 : i32, i32
  }
  func.func @transform_4(%arg0: i32) -> (i32, i32) {
    %c0_i32 = arith.constant 0 : i32
    %c0_i32_0 = arith.constant 0 : i32
    %c0_i32_1 = arith.constant 0 : i32
    return %c0_i32, %c0_i32_0 : i32, i32
  }
}

</mosaic_0001>

<bundles_post_ra>
// kernel: tpu_custom_call.1
= control target key start
LH: loop header
LB: loop body
LE: loop exit
PB: predicated region body
PF: predicated region fallthrough
CT: control target
= control target key end

     0   :  { %9 = vsyncpa [#allocation4], 0  ;;  %s1981_s0 = inlined_call_operand.hbm [shape: bf16[32,64], index: 0, kind: input, shape index: {}]   ;;  %s1982_s1 = inlined_call_operand.hbm [shape: bf16[64,128], index: 1, kind: input, shape index: {}]   ;;  %s1983_s2 = inlined_call_operand.hbm [shape: bf16[32,128], index: 2, kind: input, shape index: {}]   ;;  %s1984_s3 = inlined_call_operand.vmem [shape: f32[1,128], index: 3, kind: input, shape index: {}]   ;;  %s1985_s4 = inlined_call_operand.hbm [shape: f32[2,32], index: 4, kind: output, shape index: {}]  }
   0x1   :  { %10 = vsyncpa [#allocation7], 0 }
   0x2   :  { %11 = vsyncpa [#allocation5], 0  ;;  %s1706_s15 = smov [#allocation6]   ;;  %s1707_s17 = smov [#allocation3]  }
   0x3   :  { %s29_s16 = sshll.u32 %s1706_s15, 4  ;;  %s17_s18 = sshll.u32 %s1707_s17, 4  ;;  %s30_s16 = int_to_ptr.vmem [resolvable:$true] %s29_s16  ;;  %s18_s18 = int_to_ptr.vmem [resolvable:$true] %s17_s18 }
   0x4   :  { %s1628_s19 = scalar_lea.vmem %s30_s16, 512  ;;  %p1633_p1 = scmp.lt.s32.totalorder %s30_s16, %s30_s16 }
   0x5   :  { %p1629_p0 = scmp.ne.s32.totalorder %s30_s16, %s1628_s19  ;;  %p1634_p2 = scmp.lt.s32.totalorder %s1628_s19, %s1628_s19 }
   0x7   :  { %p1635_p3 = por %p1634_p2, %p1633_p1 }
   0x9   :  { %p1636_p4 = pnand %p1635_p3, %p1629_p0 }
   0xb   :  { %1639 = shalt.err (!%p1636_p4)
}
   0xc   :  { %s1708_s20 = smov 64   ;;  %s1709_s21 = smov 4  }
   0xd   :  { %35 = dma.hbm_to_vmem [thread:$0]  %s1982_s1, 512, %s30_s16, [#allocation7], %s1708_s20, %s1708_s20, %s1709_s21  }
   0xe   :  { %s1648_s24 = scalar_lea.vmem %s18_s18, 256  ;;  %p1653_p6 = scmp.lt.s32.totalorder %s18_s18, %s18_s18 }
   0xf   :  { %p1649_p5 = scmp.ne.s32.totalorder %s18_s18, %s1648_s24  ;;  %p1654_p7 = scmp.lt.s32.totalorder %s1648_s24, %s1648_s24 }
  0x11   :  { %p1655_p8 = por %p1654_p7, %p1653_p6 }
  0x13   :  { %p1656_p9 = pnand %p1655_p8, %p1649_p5 }
  0x15   :  { %1659 = shalt.err (!%p1656_p9)
}
  0x16   :  { %23 = dma.hbm_to_vmem [thread:$0]  %s1981_s0, 256, %s18_s18, [#allocation4], %s1708_s20, %s1708_s20, %s1709_s21  }
  0x17   :  { %s1710_s27 = smov [#allocation8]  }
  0x18   :  { %s41_s28 = sshll.u32 %s1710_s27, 4  ;;  %s42_s28 = int_to_ptr.vmem [resolvable:$true] %s41_s28 }
  0x19   :  { %s1668_s29 = scalar_lea.vmem %s42_s28, 256  ;;  %p1673_p11 = scmp.lt.s32.totalorder %s42_s28, %s42_s28 }
  0x1a   :  { %p1669_p10 = scmp.ne.s32.totalorder %s42_s28, %s1668_s29  ;;  %p1674_p12 = scmp.lt.s32.totalorder %s1668_s29, %s1668_s29 }
  0x1c   :  { %p1675_p13 = por %p1674_p12, %p1673_p11 }
  0x1e   :  { %p1676_p0 = pnand %p1675_p13, %p1669_p10 }
  0x20   :  { %1679 = shalt.err (!%p1676_p0)
}
  0x21   :  { %47 = dma.hbm_to_vmem [thread:$0]  %s1983_s2, 256, %s42_s28, [#allocation7], %s1708_s20, %s1708_s20, %s1709_s21  }
  0x22   :  { %1700 = dma.done.wait [#allocation4], 256  }
  0x23   :  { %1701 = vsyncadd [#allocation4], 4294967040 }
  0x24   :  { %1702 = dma.done.wait [#allocation7], 768  }
  0x25   :  { %1703 = vsyncadd [#allocation7], 4294966528  ;;  %v1711_v0 = vmov 0.0   ;;  %vm1712_vm0 = vmmov 0   ;;  %v1548_v1 = vld [vmem:[#allocation6 + $0x18] sm:$0xff]   ;;  %v1549_v2 = vld [vmem:[#allocation6 + $0x10] sm:$0xff]   ;;  %v177_v25 = vlaneseq }
  0x26   :  { %1409 = vmatprep.subr.bf16.mxu1 %v1711_v0  ;;  %1413 = vmatprep.mubr.msk.bf16.mxu1 %vm1712_vm0, %v1711_v0  ;;  %v1550_v3 = vld [vmem:[#allocation6 + $0x8] sm:$0xff]   ;;  %vm113_vm1 = vcmask 523264   ;;  %v1552_v4 = vld [vmem:[#allocation3] sm:$0xff]   ;;  %v1764_v6 = vld [vmem:[#allocation8] sm:$0xff]   ;;  %v1713_v9 = vmov 0   ;;  %v1714_v27 = vmov 1.0  }
  0x27   :  { %1397 = vmatprep.subr.bf16.mxu0 %v1548_v1  ;;  %v1760_v5 = vld [vmem:[#allocation8 + $0x8] sm:$0xff]   ;;  %1405 = vmatprep.mubr.msk.bf16.mxu0 %vm113_vm1, %v1552_v4  ;;  %v1551_v7 = vld [vmem:[#allocation6] sm:$0xff]   ;;  %v1554_v8 = vld [vmem:[#allocation3 + $0x8] sm:$0xff]   ;;  %v178_v26 = vand.u32 127, %v177_v25  ;;  %vm195_vm3 = vcmask 261120   ;;  %s1716_s5 = smov [#allocation9]  }
  0x28   :  { %1398 = vmatpush3.bf16.msra.mxu0 %v1548_v1  ;;  %1410 = vmatpush3.bf16.msra.mxu1 %v1760_v5  ;;  %v1317_v11 = vld [vmem:[%s1984_s3] ss:$0 sm:$0xff]  ;;  %s1715_s3 = smov 32   ;;  %s1307_s6 = sshll.u32 %s1716_s5, 4  ;;  %vm1299_vm4 = vcmask 254976   ;;  %s1308_s6 = int_to_ptr.vmem [resolvable:$true] %s1307_s6 }
  0x29   :  { %1399 = vmatprep.subr.bf16.mxu0 %v1549_v2  ;;  %1411 = vmatprep.subr.bf16.mxu1 %v1711_v0  ;;  %vm179_vm2 = vcmp.lt.s32.totalorder %v178_v26, 96  ;;  %s1680_s7 = scalar_lea.vmem %s1308_s6, 32  ;;  %p1685_p2 = scmp.lt.s32.totalorder %s1308_s6, %s1308_s6 }
  0x2a   :  { %v1786_v28 = vsel %vm179_vm2, 0.5, %v1714_v27  ;;  %v1789_v30 = vsel %vm179_vm2, 0.5, %v1711_v0  ;;  %p1681_p1 = scmp.ne.s32.totalorder %s1308_s6, %s1680_s7  ;;  %p1686_p3 = scmp.lt.s32.totalorder %s1680_s7, %s1680_s7 }
  0x2c   :  { %1400 = vmatpush3.bf16.msra.mxu0 %v1549_v2  ;;  %1412 = vmatpush3.bf16.msra.mxu1 %v1764_v6  ;;  %p1687_p4 = por %p1686_p3, %p1685_p2 }
  0x2d   :  { %1401 = vmatprep.subr.bf16.mxu0 %v1550_v3  ;;  %1417 = vmatprep.subr.bf16.mxu1 %v1711_v0 }
  0x2e   :  { %p1688_p5 = pnand %p1687_p4, %p1681_p1 }
  0x2f   :  { %1414 = vmatmul.mubr.bf16.vlgmr.msra.gmra.mxu1 %v1713_v9 }
  0x30   :  { %1402 = vmatpush3.bf16.msra.mxu0 %v1550_v3  ;;  %1418 = vmatpush3.bf16.msra.mxu1 %v1760_v5 }
  0x31   :  { %1403 = vmatprep.subr.bf16.mxu0 %v1551_v7  ;;  %1419 = vmatprep.subr.bf16.mxu1 %v1711_v0 }
  0x32   :  { %1421 = vmatprep.mubr.msk.bf16.mxu1 %vm1712_vm0, %v1711_v0 }
  0x34   :  { %1404 = vmatpush3.bf16.msra.mxu0 %v1551_v7  ;;  %1420 = vmatpush3.bf16.msra.mxu1 %v1764_v6 }
  0x35   :  { %1425 = vmatprep.subr.bf16.mxu0 %v1711_v0  ;;  %1433 = vmatprep.subr.bf16.mxu1 %v1711_v0 }
  0x37   :  { %1406 = vmatmul.mubr.msk.bf16.vlgmr.msra.gmra.mxu0 %vm113_vm1, %v1554_v8 }
  0x38   :  { %1426 = vmatpush3.bf16.msra.mxu0 %v1760_v5  ;;  %1429 = vmatprep.mubr.msk.bf16.mxu0 %vm1712_vm0, %v1711_v0 }
  0x39   :  { %1427 = vmatprep.subr.bf16.mxu0 %v1711_v0 }
  0x3c   :  { %1428 = vmatpush3.bf16.msra.mxu0 %v1764_v6 }
  0x3d   :  { %1441 = vmatprep.subr.bf16.mxu0 %v1711_v0 }
  0xef   :  { %v233_v10 = vpop.f32.mrf.mxu1 }
  0xf1   :  { %v1415_v12 = vpop.f32.mrf.mxu1 }
  0xf3   :  { %v236_v14 = vpop.f32.mrf.mxu1 }
  0xf5   :  { %v1416_v17 = vpop.f32.mrf.mxu1 }
  0xf7   :  { %v1407_v13 = vpop.f32.mrf.mxu0 }
  0xf8   :  { %v163_v15 = vadd.f32 %v1407_v13, %v1317_v11 }
  0xf9   :  { %v154_v16 = vpop.f32.mrf.mxu0 }
  0xfa   :  { %171 = vst [vmem:[#allocation2 + $0x10] sm:$0xff] %v163_v15  ;;  %v155_v18 = vadd.f32 %v1317_v11, %v154_v16 }
  0xfb   :  { %v1408_v19 = vpop.f32.mrf.mxu0 }
  0xfc   :  { %169 = vst [vmem:[#allocation2] sm:$0xff] %v155_v18  ;;  %v166_v20 = vadd.f32 %v1408_v19, %v1317_v11 }
  0xfd   :  { %v157_v21 = vpop.f32.mrf.mxu0 }
  0xfe   :  { %172 = vst [vmem:[#allocation2 + $0x18] sm:$0xff] %v166_v20  ;;  %v158_v22 = vadd.f32 %v1317_v11, %v157_v21 }
 0x100   :  { %170 = vst [vmem:[#allocation2 + $0x8] sm:$0xff] %v158_v22 }
 0x103   :  { %v182_v23 = vld [vmem:[#allocation2] sm:$0x3]  ;;  %v260_v43 = vld [vmem:[#allocation2 + $0x2] sm:$0x3]  ;;  %v329_v62 = vld [vmem:[#allocation2 + $0x4] sm:$0x3] }
 0x104   :  { %v239_v24 = vadd.f32 %v233_v10, %v182_v23  ;;  %v398_v20 = vld [vmem:[#allocation2 + $0x6] sm:$0x3] }
 0x106   :  { %1556 = vtanh.f32 %v239_v24 }
 0x113   :  { %v1557_v29 = vpop.eup %1556 }
 0x114   :  { %v241_v31 = vmul.f32 %v1557_v29, %v1786_v28 }
 0x116   :  { %v242_v32 = vadd.f32 %v241_v31, %v1789_v30 }
 0x118   :  { %245 = vrot.lane.b32.xlu0 %v242_v32, %s1715_s3  ;;  %v243_v35 = vmul.f32 0.0, %v242_v32 }
 0x18a   :  { %v246_v33 = vpop.permute.xlu0 %245 }
 0x18b   :  { %v248_v34 = vmul.f32 %v246_v33, %v242_v32 }
 0x18d   :  { %250 = vrot.lane.b32.xlu0 %v248_v34, %s1715_s3 }
 0x1ff   :  { %v251_v36 = vpop.permute.xlu0 %250 }
 0x200   :  { %v253_v37 = vadd.f32 %v251_v36, %v243_v35 }
 0x202   :  { %1558 = vtanh.f32 %v253_v37 }
 0x20f   :  { %v1559_v38 = vpop.eup %1558 }
 0x210   :  { %256 = vrot.lane.b32.xlu1 %v1559_v38, %s1715_s3 }
 0x282   :  { %v257_v39 = vpop.permute.xlu1 %256 }
 0x283   :  { %v259_v40 = vmul.f32 %v257_v39, %v242_v32 }
 0x285   :  { %v261_v41 = vpack.c.bf16 %v259_v40, %v259_v40 }
 0x287   :  { %263 = vrot.lane.b32.xlu1 %v261_v41, %s1708_s20  ;;  %v467_v41 = vld [vmem:[#allocation2 + $0x8] sm:$0x3] }
 0x2f9   :  { %v264_v42 = vpop.permute.xlu1 %263 }
 0x2fa   :  { %1422 = vmatmul.mubr.msk.bf16.vlgmr.msra.gmra.mxu1 %vm195_vm3, %v264_v42 }
 0x2fb   :  { %1434 = vmatpush3.bf16.msra.mxu1 %v1760_v5  ;;  %1437 = vmatprep.mubr.msk.bf16.mxu1 %vm1712_vm0, %v1711_v0 }
 0x2fc   :  { %1435 = vmatprep.subr.bf16.mxu1 %v1711_v0 }
 0x2ff   :  { %1436 = vmatpush3.bf16.msra.mxu1 %v1764_v6 }
 0x300   :  { %1449 = vmatprep.subr.bf16.mxu1 %v1711_v0 }
 0x3ba   :  { %v302_v44 = vpop.f32.mrf.mxu1 }
 0x3bb   :  { %v308_v45 = vadd.f32 %v302_v44, %v260_v43 }
 0x3bc   :  { %v1423_v46 = vpop.f32.mrf.mxu1 }
 0x3bd   :  { %1560 = vtanh.f32 %v308_v45 }
 0x3be   :  { %v305_v47 = vpop.f32.mrf.mxu1 }
 0x3c0   :  { %v1424_v48 = vpop.f32.mrf.mxu1 }
 0x3ca   :  { %v1561_v49 = vpop.eup %1560 }
 0x3cb   :  { %v310_v50 = vmul.f32 %v1561_v49, %v1786_v28 }
 0x3cd   :  { %v311_v51 = vadd.f32 %v310_v50, %v1789_v30 }
 0x3cf   :  { %314 = vrot.lane.b32.xlu0 %v311_v51, %s1715_s3  ;;  %v312_v54 = vmul.f32 %v311_v51, %v253_v37 }
 0x441   :  { %v315_v52 = vpop.permute.xlu0 %314 }
 0x442   :  { %v317_v53 = vmul.f32 %v315_v52, %v311_v51 }
 0x444   :  { %319 = vrot.lane.b32.xlu1 %v317_v53, %s1715_s3 }
 0x4b6   :  { %v320_v55 = vpop.permute.xlu1 %319 }
 0x4b7   :  { %v322_v56 = vadd.f32 %v320_v55, %v312_v54 }
 0x4b9   :  { %1562 = vtanh.f32 %v322_v56 }
 0x4c6   :  { %v1563_v57 = vpop.eup %1562 }
 0x4c7   :  { %325 = vrot.lane.b32.xlu0 %v1563_v57, %s1715_s3 }
 0x539   :  { %v326_v58 = vpop.permute.xlu0 %325 }
 0x53a   :  { %v328_v59 = vmul.f32 %v326_v58, %v311_v51 }
 0x53c   :  { %v330_v60 = vpack.c.bf16 %v328_v59, %v328_v59 }
 0x53e   :  { %332 = vrot.lane.b32.xlu1 %v330_v60, %s1708_s20  ;;  %v536_v60 = vld [vmem:[#allocation2 + $0xa] sm:$0x3] }
 0x5b0   :  { %v333_v61 = vpop.permute.xlu1 %332 }
 0x5b1   :  { %1430 = vmatmul.mubr.msk.bf16.vlgmr.msra.gmra.mxu0 %vm195_vm3, %v333_v61 }
 0x5b2   :  { %1442 = vmatpush3.bf16.msra.mxu0 %v1760_v5  ;;  %1445 = vmatprep.mubr.msk.bf16.mxu0 %vm1712_vm0, %v1711_v0 }
 0x5b3   :  { %1443 = vmatprep.subr.bf16.mxu0 %v1711_v0 }
 0x5b6   :  { %1444 = vmatpush3.bf16.msra.mxu0 %v1764_v6 }
 0x5b7   :  { %1457 = vmatprep.subr.bf16.mxu0 %v1711_v0 }
 0x671   :  { %v371_v63 = vpop.f32.mrf.mxu0 }
 0x672   :  { %v377_v1 = vadd.f32 %v371_v63, %v329_v62 }
 0x673   :  { %v1431_v2 = vpop.f32.mrf.mxu0 }
 0x674   :  { %1564 = vtanh.f32 %v377_v1 }
 0x675   :  { %v374_v3 = vpop.f32.mrf.mxu0 }
 0x677   :  { %v1432_v4 = vpop.f32.mrf.mxu0 }
 0x681   :  { %v1565_v7 = vpop.eup %1564 }
 0x682   :  { %v379_v8 = vmul.f32 %v1565_v7, %v1786_v28 }
 0x684   :  { %v380_v9 = vadd.f32 %v379_v8, %v1789_v30 }
 0x686   :  { %383 = vrot.lane.b32.xlu0 %v380_v9, %s1715_s3  ;;  %v381_v12 = vmul.f32 %v380_v9, %v322_v56 }
 0x6f8   :  { %v384_v10 = vpop.permute.xlu0 %383 }
 0x6f9   :  { %v386_v11 = vmul.f32 %v384_v10, %v380_v9 }
 0x6fb   :  { %388 = vrot.lane.b32.xlu1 %v386_v11, %s1715_s3 }
 0x76d   :  { %v389_v13 = vpop.permute.xlu1 %388 }
 0x76e   :  { %v391_v14 = vadd.f32 %v389_v13, %v381_v12 }
 0x770   :  { %1566 = vtanh.f32 %v391_v14 }
 0x77d   :  { %v1567_v15 = vpop.eup %1566 }
 0x77e   :  { %394 = vrot.lane.b32.xlu0 %v1567_v15, %s1715_s3 }
 0x7f0   :  { %v395_v16 = vpop.permute.xlu0 %394 }
 0x7f1   :  { %v397_v17 = vmul.f32 %v395_v16, %v380_v9 }
 0x7f3   :  { %v399_v18 = vpack.c.bf16 %v397_v17, %v397_v17 }
 0x7f5   :  { %401 = vrot.lane.b32.xlu1 %v399_v18, %s1708_s20  ;;  %v605_v18 = vld [vmem:[#allocation2 + $0xc] sm:$0x3] }
 0x867   :  { %v402_v19 = vpop.permute.xlu1 %401 }
 0x868   :  { %1438 = vmatmul.mubr.msk.bf16.vlgmr.msra.gmra.mxu1 %vm195_vm3, %v402_v19 }
 0x869   :  { %1450 = vmatpush3.bf16.msra.mxu1 %v1760_v5  ;;  %1453 = vmatprep.mubr.msk.bf16.mxu1 %vm1712_vm0, %v1711_v0 }
 0x86a   :  { %1451 = vmatprep.subr.bf16.mxu1 %v1711_v0 }
 0x86d   :  { %1452 = vmatpush3.bf16.msra.mxu1 %v1764_v6 }
 0x86e   :  { %1465 = vmatprep.subr.bf16.mxu1 %v1711_v0 }
 0x928   :  { %v440_v21 = vpop.f32.mrf.mxu1 }
 0x929   :  { %v446_v22 = vadd.f32 %v440_v21, %v398_v20 }
 0x92a   :  { %v1439_v23 = vpop.f32.mrf.mxu1 }
 0x92b   :  { %1568 = vtanh.f32 %v446_v22 }
 0x92c   :  { %v443_v24 = vpop.f32.mrf.mxu1 }
 0x92e   :  { %v1440_v25 = vpop.f32.mrf.mxu1 }
 0x938   :  { %v1569_v26 = vpop.eup %1568 }
 0x939   :  { %v448_v27 = vmul.f32 %v1569_v26, %v1786_v28 }
 0x93b   :  { %v449_v29 = vadd.f32 %v448_v27, %v1789_v30 }
 0x93d   :  { %452 = vrot.lane.b32.xlu0 %v449_v29, %s1715_s3  ;;  %v450_v33 = vmul.f32 %v449_v29, %v391_v14 }
 0x9af   :  { %v453_v31 = vpop.permute.xlu0 %452 }
 0x9b0   :  { %v455_v32 = vmul.f32 %v453_v31, %v449_v29 }
 0x9b2   :  { %457 = vrot.lane.b32.xlu1 %v455_v32, %s1715_s3 }
 0xa24   :  { %v458_v34 = vpop.permute.xlu1 %457 }
 0xa25   :  { %v460_v35 = vadd.f32 %v458_v34, %v450_v33 }
 0xa27   :  { %1570 = vtanh.f32 %v460_v35 }
 0xa34   :  { %v1571_v36 = vpop.eup %1570 }
 0xa35   :  { %463 = vrot.lane.b32.xlu0 %v1571_v36, %s1715_s3 }
 0xaa7   :  { %v464_v37 = vpop.permute.xlu0 %463 }
 0xaa8   :  { %v466_v38 = vmul.f32 %v464_v37, %v449_v29 }
 0xaaa   :  { %v468_v39 = vpack.c.bf16 %v466_v38, %v466_v38 }
 0xaac   :  { %470 = vrot.lane.b32.xlu1 %v468_v39, %s1708_s20  ;;  %v674_v39 = vld [vmem:[#allocation2 + $0xe] sm:$0x3] }
 0xb1e   :  { %v471_v40 = vpop.permute.xlu1 %470 }
 0xb1f   :  { %1446 = vmatmul.mubr.msk.bf16.vlgmr.msra.gmra.mxu0 %vm195_vm3, %v471_v40 }
 0xb20   :  { %1458 = vmatpush3.bf16.msra.mxu0 %v1760_v5  ;;  %1461 = vmatprep.mubr.msk.bf16.mxu0 %vm1712_vm0, %v1711_v0 }
 0xb21   :  { %1459 = vmatprep.subr.bf16.mxu0 %v1711_v0 }
 0xb24   :  { %1460 = vmatpush3.bf16.msra.mxu0 %v1764_v6 }
 0xb25   :  { %1473 = vmatprep.subr.bf16.mxu0 %v1711_v0 }
 0xbdf   :  { %v509_v42 = vpop.f32.mrf.mxu0 }
 0xbe0   :  { %v515_v43 = vadd.f32 %v509_v42, %v467_v41 }
 0xbe1   :  { %v1447_v44 = vpop.f32.mrf.mxu0 }
 0xbe2   :  { %1572 = vtanh.f32 %v515_v43 }
 0xbe3   :  { %v512_v45 = vpop.f32.mrf.mxu0 }
 0xbe5   :  { %v1448_v46 = vpop.f32.mrf.mxu0 }
 0xbef   :  { %v1573_v47 = vpop.eup %1572 }
 0xbf0   :  { %v517_v48 = vmul.f32 %v1573_v47, %v1786_v28 }
 0xbf2   :  { %v518_v49 = vadd.f32 %v517_v48, %v1789_v30 }
 0xbf4   :  { %521 = vrot.lane.b32.xlu0 %v518_v49, %s1715_s3  ;;  %v519_v52 = vmul.f32 %v518_v49, %v460_v35 }
 0xc66   :  { %v522_v50 = vpop.permute.xlu0 %521 }
 0xc67   :  { %v524_v51 = vmul.f32 %v522_v50, %v518_v49 }
 0xc69   :  { %526 = vrot.lane.b32.xlu1 %v524_v51, %s1715_s3 }
 0xcdb   :  { %v527_v53 = vpop.permute.xlu1 %526 }
 0xcdc   :  { %v529_v54 = vadd.f32 %v527_v53, %v519_v52 }
 0xcde   :  { %1574 = vtanh.f32 %v529_v54 }
 0xceb   :  { %v1575_v55 = vpop.eup %1574 }
 0xcec   :  { %532 = vrot.lane.b32.xlu0 %v1575_v55, %s1715_s3 }
 0xd5e   :  { %v533_v56 = vpop.permute.xlu0 %532 }
 0xd5f   :  { %v535_v57 = vmul.f32 %v533_v56, %v518_v49 }
 0xd61   :  { %v537_v58 = vpack.c.bf16 %v535_v57, %v535_v57 }
 0xd63   :  { %539 = vrot.lane.b32.xlu1 %v537_v58, %s1708_s20  ;;  %v743_v58 = vld [vmem:[#allocation2 + $0x10] sm:$0x3] }
 0xdd5   :  { %v540_v59 = vpop.permute.xlu1 %539 }
 0xdd6   :  { %1454 = vmatmul.mubr.msk.bf16.vlgmr.msra.gmra.mxu1 %vm195_vm3, %v540_v59 }
 0xdd7   :  { %1466 = vmatpush3.bf16.msra.mxu1 %v1760_v5  ;;  %1469 = vmatprep.mubr.msk.bf16.mxu1 %vm1712_vm0, %v1711_v0 }
 0xdd8   :  { %1467 = vmatprep.subr.bf16.mxu1 %v1711_v0 }
 0xddb   :  { %1468 = vmatpush3.bf16.msra.mxu1 %v1764_v6 }
 0xddc   :  { %1481 = vmatprep.subr.bf16.mxu1 %v1711_v0 }
 0xe96   :  { %v578_v61 = vpop.f32.mrf.mxu1 }
 0xe97   :  { %v584_v62 = vadd.f32 %v578_v61, %v536_v60 }
 0xe98   :  { %v1455_v63 = vpop.f32.mrf.mxu1 }
 0xe99   :  { %1576 = vtanh.f32 %v584_v62 }
 0xe9a   :  { %v581_v1 = vpop.f32.mrf.mxu1 }
 0xe9c   :  { %v1456_v2 = vpop.f32.mrf.mxu1 }
 0xea6   :  { %v1577_v3 = vpop.eup %1576 }
 0xea7   :  { %v586_v4 = vmul.f32 %v1577_v3, %v1786_v28 }
 0xea9   :  { %v587_v7 = vadd.f32 %v586_v4, %v1789_v30 }
 0xeab   :  { %590 = vrot.lane.b32.xlu0 %v587_v7, %s1715_s3  ;;  %v588_v10 = vmul.f32 %v587_v7, %v529_v54 }
 0xf1d   :  { %v591_v8 = vpop.permute.xlu0 %590 }
 0xf1e   :  { %v593_v9 = vmul.f32 %v591_v8, %v587_v7 }
 0xf20   :  { %595 = vrot.lane.b32.xlu1 %v593_v9, %s1715_s3 }
 0xf92   :  { %v596_v11 = vpop.permute.xlu1 %595 }
 0xf93   :  { %v598_v12 = vadd.f32 %v596_v11, %v588_v10 }
 0xf95   :  { %1578 = vtanh.f32 %v598_v12 }
 0xfa2   :  { %v1579_v13 = vpop.eup %1578 }
 0xfa3   :  { %601 = vrot.lane.b32.xlu0 %v1579_v13, %s1715_s3 }
0x1015   :  { %v602_v14 = vpop.permute.xlu0 %601 }
0x1016   :  { %v604_v15 = vmul.f32 %v602_v14, %v587_v7 }
0x1018   :  { %v606_v16 = vpack.c.bf16 %v604_v15, %v604_v15 }
0x101a   :  { %608 = vrot.lane.b32.xlu1 %v606_v16, %s1708_s20  ;;  %v812_v16 = vld [vmem:[#allocation2 + $0x12] sm:$0x3] }
0x108c   :  { %v609_v17 = vpop.permute.xlu1 %608 }
0x108d   :  { %1462 = vmatmul.mubr.msk.bf16.vlgmr.msra.gmra.mxu0 %vm195_vm3, %v609_v17 }
0x108e   :  { %1474 = vmatpush3.bf16.msra.mxu0 %v1760_v5  ;;  %1477 = vmatprep.mubr.msk.bf16.mxu0 %vm1712_vm0, %v1711_v0 }
0x108f   :  { %1475 = vmatprep.subr.bf16.mxu0 %v1711_v0 }
0x1092   :  { %1476 = vmatpush3.bf16.msra.mxu0 %v1764_v6 }
0x1093   :  { %1489 = vmatprep.subr.bf16.mxu0 %v1711_v0 }
0x114d   :  { %v647_v19 = vpop.f32.mrf.mxu0 }
0x114e   :  { %v653_v20 = vadd.f32 %v647_v19, %v605_v18 }
0x114f   :  { %v1463_v21 = vpop.f32.mrf.mxu0 }
0x1150   :  { %1580 = vtanh.f32 %v653_v20 }
0x1151   :  { %v650_v22 = vpop.f32.mrf.mxu0 }
0x1153   :  { %v1464_v23 = vpop.f32.mrf.mxu0 }
0x115d   :  { %v1581_v24 = vpop.eup %1580 }
0x115e   :  { %v655_v25 = vmul.f32 %v1581_v24, %v1786_v28 }
0x1160   :  { %v656_v26 = vadd.f32 %v655_v25, %v1789_v30 }
0x1162   :  { %659 = vrot.lane.b32.xlu0 %v656_v26, %s1715_s3  ;;  %v657_v31 = vmul.f32 %v656_v26, %v598_v12 }
0x11d4   :  { %v660_v27 = vpop.permute.xlu0 %659 }
0x11d5   :  { %v662_v29 = vmul.f32 %v660_v27, %v656_v26 }
0x11d7   :  { %664 = vrot.lane.b32.xlu1 %v662_v29, %s1715_s3 }
0x1249   :  { %v665_v32 = vpop.permute.xlu1 %664 }
0x124a   :  { %v667_v33 = vadd.f32 %v665_v32, %v657_v31 }
0x124c   :  { %1582 = vtanh.f32 %v667_v33 }
0x1259   :  { %v1583_v34 = vpop.eup %1582 }
0x125a   :  { %670 = vrot.lane.b32.xlu0 %v1583_v34, %s1715_s3 }
0x12cc   :  { %v671_v35 = vpop.permute.xlu0 %670 }
0x12cd   :  { %v673_v36 = vmul.f32 %v671_v35, %v656_v26 }
0x12cf   :  { %v675_v37 = vpack.c.bf16 %v673_v36, %v673_v36 }
0x12d1   :  { %677 = vrot.lane.b32.xlu1 %v675_v37, %s1708_s20  ;;  %v881_v37 = vld [vmem:[#allocation2 + $0x14] sm:$0x3] }
0x1343   :  { %v678_v38 = vpop.permute.xlu1 %677 }
0x1344   :  { %1470 = vmatmul.mubr.msk.bf16.vlgmr.msra.gmra.mxu1 %vm195_vm3, %v678_v38 }
0x1345   :  { %1482 = vmatpush3.bf16.msra.mxu1 %v1760_v5  ;;  %1485 = vmatprep.mubr.msk.bf16.mxu1 %vm1712_vm0, %v1711_v0 }
0x1346   :  { %1483 = vmatprep.subr.bf16.mxu1 %v1711_v0 }
0x1349   :  { %1484 = vmatpush3.bf16.msra.mxu1 %v1764_v6 }
0x134a   :  { %1497 = vmatprep.subr.bf16.mxu1 %v1711_v0 }
0x1404   :  { %v716_v40 = vpop.f32.mrf.mxu1 }
0x1405   :  { %v722_v41 = vadd.f32 %v716_v40, %v674_v39 }
0x1406   :  { %v1471_v42 = vpop.f32.mrf.mxu1 }
0x1407   :  { %1584 = vtanh.f32 %v722_v41 }
0x1408   :  { %v719_v43 = vpop.f32.mrf.mxu1 }
0x140a   :  { %v1472_v44 = vpop.f32.mrf.mxu1 }
0x1414   :  { %v1585_v45 = vpop.eup %1584 }
0x1415   :  { %v724_v46 = vmul.f32 %v1585_v45, %v1786_v28 }
0x1417   :  { %v725_v47 = vadd.f32 %v724_v46, %v1789_v30 }
0x1419   :  { %728 = vrot.lane.b32.xlu0 %v725_v47, %s1715_s3  ;;  %v726_v50 = vmul.f32 %v725_v47, %v667_v33 }
0x148b   :  { %v729_v48 = vpop.permute.xlu0 %728 }
0x148c   :  { %v731_v49 = vmul.f32 %v729_v48, %v725_v47 }
0x148e   :  { %733 = vrot.lane.b32.xlu1 %v731_v49, %s1715_s3 }
0x1500   :  { %v734_v51 = vpop.permute.xlu1 %733 }
0x1501   :  { %v736_v52 = vadd.f32 %v734_v51, %v726_v50 }
0x1503   :  { %1586 = vtanh.f32 %v736_v52 }
0x1510   :  { %v1587_v53 = vpop.eup %1586 }
0x1511   :  { %739 = vrot.lane.b32.xlu0 %v1587_v53, %s1715_s3 }
0x1583   :  { %v740_v54 = vpop.permute.xlu0 %739 }
0x1584   :  { %v742_v55 = vmul.f32 %v740_v54, %v725_v47 }
0x1586   :  { %v744_v56 = vpack.c.bf16 %v742_v55, %v742_v55 }
0x1588   :  { %746 = vrot.lane.b32.xlu1 %v744_v56, %s1708_s20  ;;  %v950_v56 = vld [vmem:[#allocation2 + $0x16] sm:$0x3] }
0x15fa   :  { %v747_v57 = vpop.permute.xlu1 %746 }
0x15fb   :  { %1478 = vmatmul.mubr.msk.bf16.vlgmr.msra.gmra.mxu0 %vm195_vm3, %v747_v57 }
0x15fc   :  { %1490 = vmatpush3.bf16.msra.mxu0 %v1760_v5  ;;  %1493 = vmatprep.mubr.msk.bf16.mxu0 %vm1712_vm0, %v1711_v0 }
0x15fd   :  { %1491 = vmatprep.subr.bf16.mxu0 %v1711_v0 }
0x1600   :  { %1492 = vmatpush3.bf16.msra.mxu0 %v1764_v6 }
0x1601   :  { %1505 = vmatprep.subr.bf16.mxu0 %v1711_v0 }
0x16bb   :  { %v785_v59 = vpop.f32.mrf.mxu0 }
0x16bc   :  { %v791_v60 = vadd.f32 %v785_v59, %v743_v58 }
0x16bd   :  { %v1479_v61 = vpop.f32.mrf.mxu0 }
0x16be   :  { %1588 = vtanh.f32 %v791_v60 }
0x16bf   :  { %v788_v62 = vpop.f32.mrf.mxu0 }
0x16c1   :  { %v1480_v63 = vpop.f32.mrf.mxu0 }
0x16cb   :  { %v1589_v1 = vpop.eup %1588 }
0x16cc   :  { %v793_v2 = vmul.f32 %v1589_v1, %v1786_v28 }
0x16ce   :  { %v794_v3 = vadd.f32 %v793_v2, %v1789_v30 }
0x16d0   :  { %797 = vrot.lane.b32.xlu0 %v794_v3, %s1715_s3  ;;  %v795_v8 = vmul.f32 %v794_v3, %v736_v52 }
0x1742   :  { %v798_v4 = vpop.permute.xlu0 %797 }
0x1743   :  { %v800_v7 = vmul.f32 %v798_v4, %v794_v3 }
0x1745   :  { %802 = vrot.lane.b32.xlu1 %v800_v7, %s1715_s3 }
0x17b7   :  { %v803_v9 = vpop.permute.xlu1 %802 }
0x17b8   :  { %v805_v10 = vadd.f32 %v803_v9, %v795_v8 }
0x17ba   :  { %1590 = vtanh.f32 %v805_v10 }
0x17c7   :  { %v1591_v11 = vpop.eup %1590 }
0x17c8   :  { %808 = vrot.lane.b32.xlu0 %v1591_v11, %s1715_s3 }
0x183a   :  { %v809_v12 = vpop.permute.xlu0 %808 }
0x183b   :  { %v811_v13 = vmul.f32 %v809_v12, %v794_v3 }
0x183d   :  { %v813_v14 = vpack.c.bf16 %v811_v13, %v811_v13 }
0x183f   :  { %815 = vrot.lane.b32.xlu1 %v813_v14, %s1708_s20  ;;  %v1019_v14 = vld [vmem:[#allocation2 + $0x18] sm:$0x3] }
0x18b1   :  { %v816_v15 = vpop.permute.xlu1 %815 }
0x18b2   :  { %1486 = vmatmul.mubr.msk.bf16.vlgmr.msra.gmra.mxu1 %vm195_vm3, %v816_v15 }
0x18b3   :  { %1498 = vmatpush3.bf16.msra.mxu1 %v1760_v5  ;;  %1501 = vmatprep.mubr.msk.bf16.mxu1 %vm1712_vm0, %v1711_v0 }
0x18b4   :  { %1499 = vmatprep.subr.bf16.mxu1 %v1711_v0 }
0x18b7   :  { %1500 = vmatpush3.bf16.msra.mxu1 %v1764_v6 }
0x18b8   :  { %1513 = vmatprep.subr.bf16.mxu1 %v1711_v0 }
0x1972   :  { %v854_v17 = vpop.f32.mrf.mxu1 }
0x1973   :  { %v860_v18 = vadd.f32 %v854_v17, %v812_v16 }
0x1974   :  { %v1487_v19 = vpop.f32.mrf.mxu1 }
0x1975   :  { %1592 = vtanh.f32 %v860_v18 }
0x1976   :  { %v857_v20 = vpop.f32.mrf.mxu1 }
0x1978   :  { %v1488_v21 = vpop.f32.mrf.mxu1 }
0x1982   :  { %v1593_v22 = vpop.eup %1592 }
0x1983   :  { %v862_v23 = vmul.f32 %v1593_v22, %v1786_v28 }
0x1985   :  { %v863_v24 = vadd.f32 %v862_v23, %v1789_v30 }
0x1987   :  { %866 = vrot.lane.b32.xlu0 %v863_v24, %s1715_s3  ;;  %v864_v27 = vmul.f32 %v863_v24, %v805_v10 }
0x19f9   :  { %v867_v25 = vpop.permute.xlu0 %866 }
0x19fa   :  { %v869_v26 = vmul.f32 %v867_v25, %v863_v24 }
0x19fc   :  { %871 = vrot.lane.b32.xlu1 %v869_v26, %s1715_s3 }
0x1a6e   :  { %v872_v29 = vpop.permute.xlu1 %871 }
0x1a6f   :  { %v874_v31 = vadd.f32 %v872_v29, %v864_v27 }
0x1a71   :  { %1594 = vtanh.f32 %v874_v31 }
0x1a7e   :  { %v1595_v32 = vpop.eup %1594 }
0x1a7f   :  { %877 = vrot.lane.b32.xlu0 %v1595_v32, %s1715_s3 }
0x1af1   :  { %v878_v33 = vpop.permute.xlu0 %877 }
0x1af2   :  { %v880_v34 = vmul.f32 %v878_v33, %v863_v24 }
0x1af4   :  { %v882_v35 = vpack.c.bf16 %v880_v34, %v880_v34 }
0x1af6   :  { %884 = vrot.lane.b32.xlu1 %v882_v35, %s1708_s20  ;;  %v1088_v35 = vld [vmem:[#allocation2 + $0x1a] sm:$0x3] }
0x1b68   :  { %v885_v36 = vpop.permute.xlu1 %884 }
0x1b69   :  { %1494 = vmatmul.mubr.msk.bf16.vlgmr.msra.gmra.mxu0 %vm195_vm3, %v885_v36 }
0x1b6a   :  { %1506 = vmatpush3.bf16.msra.mxu0 %v1760_v5  ;;  %1509 = vmatprep.mubr.msk.bf16.mxu0 %vm1712_vm0, %v1711_v0 }
0x1b6b   :  { %1507 = vmatprep.subr.bf16.mxu0 %v1711_v0 }
0x1b6e   :  { %1508 = vmatpush3.bf16.msra.mxu0 %v1764_v6 }
0x1b6f   :  { %1521 = vmatprep.subr.bf16.mxu0 %v1711_v0 }
0x1c29   :  { %v923_v38 = vpop.f32.mrf.mxu0 }
0x1c2a   :  { %v929_v39 = vadd.f32 %v923_v38, %v881_v37 }
0x1c2b   :  { %v1495_v40 = vpop.f32.mrf.mxu0 }
0x1c2c   :  { %1596 = vtanh.f32 %v929_v39 }
0x1c2d   :  { %v926_v41 = vpop.f32.mrf.mxu0 }
0x1c2f   :  { %v1496_v42 = vpop.f32.mrf.mxu0 }
0x1c39   :  { %v1597_v43 = vpop.eup %1596 }
0x1c3a   :  { %v931_v44 = vmul.f32 %v1597_v43, %v1786_v28 }
0x1c3c   :  { %v932_v45 = vadd.f32 %v931_v44, %v1789_v30 }
0x1c3e   :  { %935 = vrot.lane.b32.xlu0 %v932_v45, %s1715_s3  ;;  %v933_v48 = vmul.f32 %v932_v45, %v874_v31 }
0x1cb0   :  { %v936_v46 = vpop.permute.xlu0 %935 }
0x1cb1   :  { %v938_v47 = vmul.f32 %v936_v46, %v932_v45 }
0x1cb3   :  { %940 = vrot.lane.b32.xlu1 %v938_v47, %s1715_s3 }
0x1d25   :  { %v941_v49 = vpop.permute.xlu1 %940 }
0x1d26   :  { %v943_v50 = vadd.f32 %v941_v49, %v933_v48 }
0x1d28   :  { %1598 = vtanh.f32 %v943_v50 }
0x1d35   :  { %v1599_v51 = vpop.eup %1598 }
0x1d36   :  { %946 = vrot.lane.b32.xlu0 %v1599_v51, %s1715_s3  ;;  %v1157_v51 = vld [vmem:[#allocation2 + $0x1c] sm:$0x3] }
0x1da8   :  { %v947_v52 = vpop.permute.xlu0 %946 }
0x1da9   :  { %v949_v53 = vmul.f32 %v947_v52, %v932_v45 }
0x1dab   :  { %v951_v54 = vpack.c.bf16 %v949_v53, %v949_v53 }
0x1dad   :  { %953 = vrot.lane.b32.xlu1 %v951_v54, %s1708_s20 }
0x1e1f   :  { %v954_v55 = vpop.permute.xlu1 %953 }
0x1e20   :  { %1502 = vmatmul.mubr.msk.bf16.vlgmr.msra.gmra.mxu1 %vm195_vm3, %v954_v55 }
0x1e21   :  { %1514 = vmatpush3.bf16.msra.mxu1 %v1760_v5  ;;  %1517 = vmatprep.mubr.msk.bf16.mxu1 %vm1712_vm0, %v1711_v0 }
0x1e22   :  { %1515 = vmatprep.subr.bf16.mxu1 %v1711_v0 }
0x1e25   :  { %1516 = vmatpush3.bf16.msra.mxu1 %v1764_v6 }
0x1e26   :  { %1529 = vmatprep.subr.bf16.mxu1 %v1711_v0 }
0x1ee0   :  { %v992_v57 = vpop.f32.mrf.mxu1 }
0x1ee1   :  { %v998_v58 = vadd.f32 %v992_v57, %v950_v56 }
0x1ee2   :  { %v1503_v59 = vpop.f32.mrf.mxu1 }
0x1ee3   :  { %1600 = vtanh.f32 %v998_v58 }
0x1ee4   :  { %v995_v60 = vpop.f32.mrf.mxu1 }
0x1ee6   :  { %v1504_v61 = vpop.f32.mrf.mxu1 }
0x1ef0   :  { %v1601_v62 = vpop.eup %1600 }
0x1ef1   :  { %v1000_v63 = vmul.f32 %v1601_v62, %v1786_v28 }
0x1ef3   :  { %v1001_v1 = vadd.f32 %v1000_v63, %v1789_v30 }
0x1ef5   :  { %1004 = vrot.lane.b32.xlu0 %v1001_v1, %s1715_s3  ;;  %v1002_v4 = vmul.f32 %v1001_v1, %v943_v50 }
0x1f67   :  { %v1005_v2 = vpop.permute.xlu0 %1004 }
0x1f68   :  { %v1007_v3 = vmul.f32 %v1005_v2, %v1001_v1 }
0x1f6a   :  { %1009 = vrot.lane.b32.xlu1 %v1007_v3, %s1715_s3 }
0x1fdc   :  { %v1010_v7 = vpop.permute.xlu1 %1009 }
0x1fdd   :  { %v1012_v8 = vadd.f32 %v1010_v7, %v1002_v4 }
0x1fdf   :  { %1602 = vtanh.f32 %v1012_v8 }
0x1fec   :  { %v1603_v9 = vpop.eup %1602 }
0x1fed   :  { %1015 = vrot.lane.b32.xlu0 %v1603_v9, %s1715_s3  ;;  %v1226_v9 = vld [vmem:[#allocation2 + $0x1e] sm:$0x3] }
0x205f   :  { %v1016_v10 = vpop.permute.xlu0 %1015 }
0x2060   :  { %v1018_v11 = vmul.f32 %v1016_v10, %v1001_v1 }
0x2062   :  { %v1020_v12 = vpack.c.bf16 %v1018_v11, %v1018_v11 }
0x2064   :  { %1022 = vrot.lane.b32.xlu1 %v1020_v12, %s1708_s20 }
0x20d6   :  { %v1023_v13 = vpop.permute.xlu1 %1022 }
0x20d7   :  { %1510 = vmatmul.mubr.msk.bf16.vlgmr.msra.gmra.mxu0 %vm195_vm3, %v1023_v13 }
0x20d8   :  { %1522 = vmatpush3.bf16.msra.mxu0 %v1760_v5  ;;  %1525 = vmatprep.mubr.msk.bf16.mxu0 %vm1712_vm0, %v1711_v0 }
0x20d9   :  { %1523 = vmatprep.subr.bf16.mxu0 %v1711_v0 }
0x20dc   :  { %1524 = vmatpush3.bf16.msra.mxu0 %v1764_v6 }
0x2197   :  { %v1061_v15 = vpop.f32.mrf.mxu0 }
0x2198   :  { %v1067_v16 = vadd.f32 %v1061_v15, %v1019_v14 }
0x2199   :  { %v1511_v17 = vpop.f32.mrf.mxu0 }
0x219a   :  { %1604 = vtanh.f32 %v1067_v16 }
0x219b   :  { %v1064_v18 = vpop.f32.mrf.mxu0 }
0x219d   :  { %v1512_v19 = vpop.f32.mrf.mxu0 }
0x21a7   :  { %v1605_v20 = vpop.eup %1604 }
0x21a8   :  { %v1069_v21 = vmul.f32 %v1605_v20, %v1786_v28 }
0x21aa   :  { %v1070_v22 = vadd.f32 %v1069_v21, %v1789_v30 }
0x21ac   :  { %1073 = vrot.lane.b32.xlu0 %v1070_v22, %s1715_s3  ;;  %v1071_v25 = vmul.f32 %v1070_v22, %v1012_v8 }
0x221e   :  { %v1074_v23 = vpop.permute.xlu0 %1073 }
0x221f   :  { %v1076_v24 = vmul.f32 %v1074_v23, %v1070_v22 }
0x2221   :  { %1078 = vrot.lane.b32.xlu1 %v1076_v24, %s1715_s3 }
0x2293   :  { %v1079_v26 = vpop.permute.xlu1 %1078 }
0x2294   :  { %v1081_v27 = vadd.f32 %v1079_v26, %v1071_v25 }
0x2296   :  { %1606 = vtanh.f32 %v1081_v27 }
0x22a3   :  { %v1607_v29 = vpop.eup %1606 }
0x22a4   :  { %1084 = vrot.lane.b32.xlu0 %v1607_v29, %s1715_s3 }
0x2316   :  { %v1085_v31 = vpop.permute.xlu0 %1084 }
0x2317   :  { %v1087_v32 = vmul.f32 %v1085_v31, %v1070_v22 }
0x2319   :  { %v1089_v33 = vpack.c.bf16 %v1087_v32, %v1087_v32 }
0x231b   :  { %1091 = vrot.lane.b32.xlu1 %v1089_v33, %s1708_s20 }
0x238d   :  { %v1092_v34 = vpop.permute.xlu1 %1091 }
0x238e   :  { %1518 = vmatmul.mubr.msk.bf16.vlgmr.msra.gmra.mxu1 %vm195_vm3, %v1092_v34 }
0x238f   :  { %1530 = vmatpush3.bf16.msra.mxu1 %v1760_v5  ;;  %1533 = vmatprep.mubr.msk.bf16.mxu1 %vm1712_vm0, %v1711_v0 }
0x2390   :  { %1531 = vmatprep.subr.bf16.mxu1 %v1711_v0 }
0x2393   :  { %1532 = vmatpush3.bf16.msra.mxu1 %v1764_v6 }
0x244e   :  { %v1130_v36 = vpop.f32.mrf.mxu1 }
0x244f   :  { %v1136_v37 = vadd.f32 %v1130_v36, %v1088_v35 }
0x2450   :  { %v1519_v38 = vpop.f32.mrf.mxu1 }
0x2451   :  { %1608 = vtanh.f32 %v1136_v37 }
0x2452   :  { %v1133_v39 = vpop.f32.mrf.mxu1 }
0x2454   :  { %v1520_v40 = vpop.f32.mrf.mxu1 }
0x245e   :  { %v1609_v41 = vpop.eup %1608 }
0x245f   :  { %v1138_v42 = vmul.f32 %v1609_v41, %v1786_v28 }
0x2461   :  { %v1139_v43 = vadd.f32 %v1138_v42, %v1789_v30 }
0x2463   :  { %1142 = vrot.lane.b32.xlu0 %v1139_v43, %s1715_s3  ;;  %v1140_v0 = vmul.f32 %v1139_v43, %v1081_v27 }
0x24d5   :  { %v1143_v5 = vpop.permute.xlu0 %1142 }
0x24d6   :  { %v1145_v44 = vmul.f32 %v1143_v5, %v1139_v43 }
0x24d8   :  { %1147 = vrot.lane.b32.xlu1 %v1145_v44, %s1715_s3 }
0x254a   :  { %v1148_v6 = vpop.permute.xlu1 %1147 }
0x254b   :  { %v1150_v45 = vadd.f32 %v1148_v6, %v1140_v0 }
0x254d   :  { %1610 = vtanh.f32 %v1150_v45 }
0x255a   :  { %v1611_v46 = vpop.eup %1610 }
0x255b   :  { %1153 = vrot.lane.b32.xlu0 %v1611_v46, %s1715_s3 }
0x25cd   :  { %v1154_v47 = vpop.permute.xlu0 %1153 }
0x25ce   :  { %v1156_v48 = vmul.f32 %v1154_v47, %v1139_v43 }
0x25d0   :  { %v1158_v49 = vpack.c.bf16 %v1156_v48, %v1156_v48 }
0x25d2   :  { %1160 = vrot.lane.b32.xlu1 %v1158_v49, %s1708_s20 }
0x2644   :  { %v1161_v50 = vpop.permute.xlu1 %1160 }
0x2645   :  { %1526 = vmatmul.mubr.msk.bf16.vlgmr.msra.gmra.mxu0 %vm195_vm3, %v1161_v50 }
0x2705   :  { %v1199_v52 = vpop.f32.mrf.mxu0 }
0x2706   :  { %v1205_v53 = vadd.f32 %v1199_v52, %v1157_v51 }
0x2707   :  { %v1527_v54 = vpop.f32.mrf.mxu0 }
0x2708   :  { %1612 = vtanh.f32 %v1205_v53 }
0x2709   :  { %v1202_v55 = vpop.f32.mrf.mxu0 }
0x270b   :  { %v1528_v56 = vpop.f32.mrf.mxu0 }
0x2715   :  { %v1613_v57 = vpop.eup %1612 }
0x2716   :  { %v1207_v58 = vmul.f32 %v1613_v57, %v1786_v28 }
0x2718   :  { %v1208_v59 = vadd.f32 %v1207_v58, %v1789_v30 }
0x271a   :  { %1211 = vrot.lane.b32.xlu0 %v1208_v59, %s1715_s3  ;;  %v1209_v62 = vmul.f32 %v1208_v59, %v1150_v45 }
0x278c   :  { %v1212_v60 = vpop.permute.xlu0 %1211 }
0x278d   :  { %v1214_v61 = vmul.f32 %v1212_v60, %v1208_v59 }
0x278f   :  { %1216 = vrot.lane.b32.xlu1 %v1214_v61, %s1715_s3 }
0x2801   :  { %v1217_v63 = vpop.permute.xlu1 %1216 }
0x2802   :  { %v1219_v1 = vadd.f32 %v1217_v63, %v1209_v62 }
0x2804   :  { %1614 = vtanh.f32 %v1219_v1 }
0x2811   :  { %v1615_v2 = vpop.eup %1614 }
0x2812   :  { %1222 = vrot.lane.b32.xlu0 %v1615_v2, %s1715_s3 }
0x2884   :  { %v1223_v3 = vpop.permute.xlu0 %1222 }
0x2885   :  { %v1225_v4 = vmul.f32 %v1223_v3, %v1208_v59 }
0x2887   :  { %v1227_v7 = vpack.c.bf16 %v1225_v4, %v1225_v4 }
0x2889   :  { %1229 = vrot.lane.b32.xlu1 %v1227_v7, %s1708_s20 }
0x28fb   :  { %v1230_v8 = vpop.permute.xlu1 %1229 }
0x28fc   :  { %1534 = vmatmul.mubr.msk.bf16.vlgmr.msra.gmra.mxu1 %vm195_vm3, %v1230_v8 }
0x29bc   :  { %v1268_v10 = vpop.f32.mrf.mxu1 }
0x29bd   :  { %v1274_v11 = vadd.f32 %v1268_v10, %v1226_v9 }
0x29be   :  { %v1535_v12 = vpop.f32.mrf.mxu1 }
0x29bf   :  { %1616 = vtanh.f32 %v1274_v11 }
0x29c0   :  { %v1271_v13 = vpop.f32.mrf.mxu1 }
0x29c2   :  { %v1536_v14 = vpop.f32.mrf.mxu1 }
0x29cc   :  { %v1617_v15 = vpop.eup %1616 }
0x29cd   :  { %v1276_v16 = vmul.f32 %v1617_v15, %v1786_v28 }
0x29cf   :  { %v1277_v17 = vadd.f32 %v1276_v16, %v1789_v30 }
0x29d1   :  { %1280 = vrot.lane.b32.xlu0 %v1277_v17, %s1715_s3  ;;  %v1278_v20 = vmul.f32 %v1277_v17, %v1219_v1 }
0x2a43   :  { %v1281_v18 = vpop.permute.xlu0 %1280 }
0x2a44   :  { %v1283_v19 = vmul.f32 %v1281_v18, %v1277_v17 }
0x2a46   :  { %1285 = vrot.lane.b32.xlu1 %v1283_v19, %s1715_s3 }
0x2ab8   :  { %v1286_v21 = vpop.permute.xlu1 %1285 }
0x2ab9   :  { %v1288_v22 = vadd.f32 %v1286_v21, %v1278_v20 }
0x2abb   :  { %1618 = vtanh.f32 %v1288_v22 }
0x2ac8   :  { %v1619_v23 = vpop.eup %1618 }
0x2ac9   :  { %1291 = vrot.lane.b32.xlu0 %v1619_v23, %s1715_s3 }
0x2b3b   :  { %v1292_v24 = vpop.permute.xlu0 %1291 }
0x2b3c   :  { %v1294_v25 = vmul.f32 %v1292_v24, %v1277_v17 }
0x2b3e   :  { %1296 = vrot.lane.b32.xlu1 %v1294_v25, %s1708_s20 }
0x2bb0   :  { %v1297_v28 = vpop.permute.xlu1 %1296 }
0x2bb1   :  { %1300 = vst.msk [vmem:[#allocation9] sm:$0x3] %vm1299_vm4, %v1297_v28 }
0x2bb2   :  { %1691 = shalt.err (!%p1688_p5)
}
0x2bb3   :  { %1310 = dma.vmem_to_hbm [thread:$0]  %s1308_s6, 32, %s1985_s4, [#allocation5]  }
0x2bb4   :  { %1704 = dma.done.wait [#allocation5], 32  }
0x2bb5   :  { %1705 = vsyncadd [#allocation5], 4294967264 }
0x2bb6   :  { %1314 = vsyncpa [#allocation4], 1 }
0x2bb7   :  { %1315 = vsyncpa [#allocation7], 1 }
0x2bb8   :  { %1316 = vsyncpa [#allocation5], 1 }

</bundles_post_ra>
